<compile_context>
chip_gen: v7x
topology: tpu7x:2x2x1
jax: 0.10.0
libtpu: 0.0.40
codegen_flags: <defaults>
</compile_context>

<pallas_src>
import functools

import jax
import jax.numpy as jnp
from jax import lax
from jax.experimental import pallas as pl
from jax.experimental.pallas import tpu as pltpu

EPS = 1e-5
SLOPE = 0.1


# ----------------------------- small helpers --------------------------------

def _hw_vmem_bytes():
    try:
        return int(pltpu.get_tpu_info().vmem_capacity_bytes)
    except Exception:
        return 128 * 1024 * 1024


def _padded_bytes(shape, dtype):
    """VMEM footprint of one block, incl. (sublane, 128-lane) tiling padding."""
    itemsize = jnp.dtype(dtype).itemsize
    sub = {4: 8, 2: 16, 1: 32}.get(itemsize, 8)
    dims = list(shape) if len(shape) else [1]
    dims[-1] = -(-dims[-1] // 128) * 128
    if len(dims) >= 2:
        dims[-2] = -(-dims[-2] // sub) * sub
    total = itemsize
    for d in dims:
        total *= d
    return total


def _compiler_params(working_bytes, n_axes=1):
    cap = _hw_vmem_bytes()
    # leave headroom for compiler scratch; v7x (64 MiB / TC) gets a ~48 MiB cap.
    limit = min(int(cap * 3 // 4),
                max(32 * 1024 * 1024, int(2 * working_bytes)))
    return pltpu.CompilerParams(
        dimension_semantics=("parallel",) * n_axes,
        vmem_limit_bytes=int(limit))


def _pick_rows(n, cap):
    """Largest divisor of n that is a multiple of 8 and <= cap, else n."""
    cap = min(n, max(cap, 8))
    d = cap - cap % 8
    while d >= 8:
        if n % d == 0:
            return d
        d -= 8
    return n


# ----------------------------- banded weights -------------------------------

def _taps(w_oihw):
    # (cout, cin, 3, 3) -> (3, 3, cin, cout), taps[kh, kw][c, o] = W[o, c, kh, kw]
    return jnp.transpose(w_oihw, (2, 3, 1, 0))


def _banded_weights_s1(w_oihw, width):
    """Stride-1 bands, one per kernel row kh: ((width+2)*cin, width*cout).

    Band[(j+kw)*cin : (j+kw+1)*cin, j*cout : (j+1)*cout] = W[:, :, kh, kw].T
    so a padded input row (flattened over width*cin) times the band gives the
    full output row (flattened over width*cout)."""
    cout, cin = w_oihw.shape[0], w_oihw.shape[1]
    taps = _taps(w_oihw)
    idx = jnp.arange(width)
    bands = []
    for kh in range(3):
        b4 = jnp.zeros((width + 2, cin, width, cout), w_oihw.dtype)
        for kw in range(3):
            upd = jnp.broadcast_to(taps[kh, kw], (width, cin, cout))
            b4 = b4.at[idx + kw, :, idx, :].set(upd)
        bands.append(b4.reshape((width + 2) * cin, width * cout))
    return jnp.stack(bands).astype(jnp.bfloat16)          # (3, K, W*cout)


def _banded_weights_s2(w_oihw, wo):
    """Stride-2 bands indexed by (kh, width-parity b): ((wo+1)*cin, wo*cout)."""
    cout, cin = w_oihw.shape[0], w_oihw.shape[1]
    taps = _taps(w_oihw)
    idx = jnp.arange(wo)
    bands = []
    for kh in range(3):
        for b in range(2):
            b4 = jnp.zeros((wo + 1, cin, wo, cout), w_oihw.dtype)
            for kw in range(b, 3, 2):
                upd = jnp.broadcast_to(taps[kh, kw], (wo, cin, cout))
                b4 = b4.at[idx + kw // 2, :, idx, :].set(upd)
            bands.append(b4.reshape((wo + 1) * cin, wo * cout))
    return jnp.stack(bands).astype(jnp.bfloat16)           # (6, K, wo*cout)


def _banded_weights_1x1(w_oihw, wo):
    """1x1 conv as a block-diagonal (wo*cin, wo*cout) matmul."""
    cout, cin = w_oihw.shape[0], w_oihw.shape[1]
    m = w_oihw.reshape(cout, cin).T                         # (cin, cout)
    idx = jnp.arange(wo)
    b4 = jnp.zeros((wo, cin, wo, cout), w_oihw.dtype)
    b4 = b4.at[idx, :, idx, :].set(jnp.broadcast_to(m, (wo, cin, cout)))
    return b4.reshape(wo * cin, wo * cout).astype(jnp.bfloat16)


# ----------------------------- Pallas kernels -------------------------------

def _conv3x3_kernel(*refs, stride, ho, wo, cin, cout, pre_affine, slope):
    """One image per grid step; output + BN batch-stat partials, lane-dense.

    stride 1: x_ref (ho, wo*cin); zero-pads into a VMEM scratch
              (ho+2, (wo+2)*cin), then 3 banded matmuls (one per kernel row).
    stride 2: x_ref (4, ho+1, (wo+1)*cin) space-to-depth phases (host-built),
              6 banded matmuls (kernel row x width parity).
    Optional pre-affine: y = x*scale+bias, LeakyReLU (fused BN1 for conv2),
    applied BEFORE padding so the halo stays exactly zero.
    """
    if pre_affine:
        x_ref, w_ref, s_ref, b_ref = refs[:4]
        rest = refs[4:]
    else:
        x_ref, w_ref = refs[:2]
        rest = refs[2:]
    y_ref, sum_ref, sq_ref = rest[:3]

    nlanes = wo * cout
    acc = jnp.zeros((ho, nlanes), jnp.float32)
    if stride == 1:
        xp_ref = rest[3]
        x = x_ref[...]                                        # (ho, wo*cin) bf16
        if pre_affine:
            xf = x.astype(jnp.float32) * s_ref[...] + b_ref[...]
            x = jnp.where(xf > 0, xf, slope * xf).astype(jnp.bfloat16)
        xp_ref[...] = jnp.zeros((ho + 2, (wo + 2) * cin), jnp.bfloat16)
        xp_ref[1:ho + 1, cin:(wo + 1) * cin] = x
        for kh in range(3):
            acc += jnp.dot(xp_ref[kh:kh + ho, :], w_ref[kh],
                           preferred_element_type=jnp.float32)
    else:
        for kh in range(3):
            for b in range(2):
                acc += jnp.dot(
                    x_ref[(kh % 2) * 2 + b, kh // 2:kh // 2 + ho, :],
                    w_ref[kh * 2 + b],
                    preferred_element_type=jnp.float32)

    sum_ref[...] = jnp.sum(acc, axis=0, keepdims=True)
    sq_ref[...] = jnp.sum(acc * acc, axis=0, keepdims=True)
    y_ref[...] = acc.astype(y_ref.dtype)


def _conv1x1_kernel(x_ref, w_ref, y_ref, sum_ref, sq_ref):
    acc = jnp.dot(x_ref[...], w_ref[...], preferred_element_type=jnp.float32)
    sum_ref[...] = jnp.sum(acc, axis=0, keepdims=True)
    sq_ref[...] = jnp.sum(acc * acc, axis=0, keepdims=True)
    y_ref[...] = acc.astype(y_ref.dtype)


def _bn_res_act_kernel(x_ref, s_ref, b_ref, r_ref, o_ref, *, slope):
    y = (x_ref[...].astype(jnp.float32) * s_ref[...] + b_ref[...]
         + r_ref[...].astype(jnp.float32))
    o_ref[...] = jnp.where(y > 0, y, slope * y)


def _bn_bn_res_act_kernel(x_ref, s_ref, b_ref, r_ref, rs_ref, rb_ref, o_ref, *,
                          slope):
    y = (x_ref[...].astype(jnp.float32) * s_ref[...] + b_ref[...]
         + r_ref[...].astype(jnp.float32) * rs_ref[...] + rb_ref[...])
    o_ref[...] = jnp.where(y > 0, y, slope * y)


# ----------------------------- Pallas wrappers ------------------------------

def conv3x3_stats(x_nhwc, w_oihw, stride, *, pre_scale=None, pre_bias=None):
    """3x3 conv (padding=1, no bias) with fused per-channel batch sum / sumsq.

    Returns y (n, ho, wo*cout) bf16 plus (n, 1, wo*cout) f32 stat partials.
    """
    n, h, w, cin = x_nhwc.shape
    cout = w_oihw.shape[0]
    assert stride in (1, 2)
    ho, wo = h // stride, w // stride
    nlanes = wo * cout
    pre_affine = pre_scale is not None

    x_bf = x_nhwc.astype(jnp.bfloat16)

    if stride == 1:
        x_in = x_bf.reshape(n, h, w * cin)                    # free HBM reshape
        bands = _banded_weights_s1(w_oihw, w)                 # (3, (w+2)*cin, N)
        in_x_spec = pl.BlockSpec((None, h, w * cin), lambda i: (i, 0, 0))
        scratch = [pltpu.VMEM((h + 2, (w + 2) * cin), jnp.bfloat16)]
        xblk = _padded_bytes((h, w * cin), jnp.bfloat16)
        pad_bytes = _padded_bytes((h + 2, (w + 2) * cin), jnp.bfloat16)
    else:
        # TODO(synk): stride-2 space-to-depth split is host-side (one extra HBM
        # copy of the block input); odd H/W unsupported.
        assert h % 2 == 0 and w % 2 == 0
        xp = jnp.pad(x_bf, ((0, 0), (1, 1), (1, 1), (0, 0)))
        x_in = jnp.stack(
            [xp[:, a::2, b::2, :].reshape(n, ho + 1, (wo + 1) * cin)
             for a in range(2) for b in range(2)], axis=1)    # (n,4,ho+1,(wo+1)cin)
        bands = _banded_weights_s2(w_oihw, wo)                # (6, (wo+1)*cin, N)
        in_x_spec = pl.BlockSpec((None, 4, ho + 1, (wo + 1) * cin),
                                 lambda i: (i, 0, 0, 0))
        scratch = []
        xblk = _padded_bytes((4, ho + 1, (wo + 1) * cin), jnp.bfloat16)
        pad_bytes = 0

    nb, kdim, _ = bands.shape
    in_specs = [in_x_spec,
                pl.BlockSpec((nb, kdim, nlanes), lambda i: (0, 0, 0))]
    args = [x_in, bands]
    if pre_affine:
        in_specs += [pl.BlockSpec((1, w * cin), lambda i: (0, 0))] * 2
        args += [jnp.tile(pre_scale.reshape(1, cin), (1, w)).astype(jnp.float32),
                 jnp.tile(pre_bias.reshape(1, cin), (1, w)).astype(jnp.float32)]

    kernel = functools.partial(
        _conv3x3_kernel, stride=stride, ho=ho, wo=wo, cin=cin, cout=cout,
        pre_affine=pre_affine, slope=SLOPE)

    working = (2 * xblk + _padded_bytes(bands.shape, jnp.bfloat16) + pad_bytes
               + 2 * _padded_bytes((ho, nlanes), jnp.bfloat16)
               + 4 * _padded_bytes((1, nlanes), jnp.float32))

    y, s, sq = pl.pallas_call(
        kernel,
        out_shape=(jax.ShapeDtypeStruct((n, ho, nlanes), jnp.bfloat16),
                   jax.ShapeDtypeStruct((n, 1, nlanes), jnp.float32),
                   jax.ShapeDtypeStruct((n, 1, nlanes), jnp.float32)),
        grid=(n,),
        in_specs=in_specs,
        out_specs=(pl.BlockSpec((None, ho, nlanes), lambda i: (i, 0, 0)),
                   pl.BlockSpec((None, 1, nlanes), lambda i: (i, 0, 0)),
                   pl.BlockSpec((None, 1, nlanes), lambda i: (i, 0, 0))),
        scratch_shapes=scratch,
        compiler_params=_compiler_params(working),
    )(*args)
    return y, s, sq


def conv1x1_stats(x_nhwc, w_oihw, stride):
    """1x1 strided conv (shortcut) as a lane-dense banded matmul + fused stats."""
    n = x_nhwc.shape[0]
    cin = x_nhwc.shape[3]
    cout = w_oihw.shape[0]
    xs = x_nhwc[:, ::stride, ::stride, :].astype(jnp.bfloat16)
    ho, wo = xs.shape[1], xs.shape[2]
    nlanes = wo * cout
    x_in = xs.reshape(n, ho, wo * cin)
    band = _banded_weights_1x1(w_oihw, wo)                    # (wo*cin, wo*cout)

    working = (2 * _padded_bytes((ho, wo * cin), jnp.bfloat16)
               + _padded_bytes(band.shape, jnp.bfloat16)
               + 2 * _padded_bytes((ho, nlanes), jnp.bfloat16)
               + 4 * _padded_bytes((1, nlanes), jnp.float32))

    y, s, sq = pl.pallas_call(
        _conv1x1_kernel,
        out_shape=(jax.ShapeDtypeStruct((n, ho, nlanes), jnp.bfloat16),
                   jax.ShapeDtypeStruct((n, 1, nlanes), jnp.float32),
                   jax.ShapeDtypeStruct((n, 1, nlanes), jnp.float32)),
        grid=(n,),
        in_specs=[pl.BlockSpec((None, ho, wo * cin), lambda i: (i, 0, 0)),
                  pl.BlockSpec(band.shape, lambda i: (0, 0))],
        out_specs=(pl.BlockSpec((None, ho, nlanes), lambda i: (i, 0, 0)),
                   pl.BlockSpec((None, 1, nlanes), lambda i: (i, 0, 0)),
                   pl.BlockSpec((None, 1, nlanes), lambda i: (i, 0, 0))),
        compiler_params=_compiler_params(working),
    )(x_in, band)
    return y, s, sq


def _reduce_stats(part, wo, cout):
    """(n, 1, wo*cout) per-image partials -> per-channel (cout,). Tiny glue."""
    return jnp.sum(part, axis=(0, 1)).reshape(wo, cout).sum(axis=0)


def _bn_scale_bias(s, sq, count, gamma, beta):
    """Fold batch stats + affine params into per-channel scale/bias.

    TODO(synk): E[x^2]-E[x]^2 in f32 can cancel when |mean| >> std; switch to a
    pivoted sum-of-squares if such inputs appear.
    """
    mean = s / count
    var = sq / count - mean * mean          # biased variance (PyTorch training)
    scale = gamma * lax.rsqrt(var + EPS)
    bias = beta - mean * scale
    return scale.reshape(1, -1), bias.reshape(1, -1)


def bn_residual_act(y2, scale, bias, residual, *, wo, res_scale=None,
                    res_bias=None, slope=SLOPE):
    """Fused BN2 [+ shortcut BN] + residual add + LeakyReLU, lane-dense layout."""
    n, ho, nlanes = y2.shape
    rtot = n * ho
    x2d = y2.reshape(rtot, nlanes)
    r2d = residual.reshape(rtot, nlanes)
    scf = jnp.tile(scale, (1, wo)).astype(jnp.float32)
    bsf = jnp.tile(bias, (1, wo)).astype(jnp.float32)

    n_slabs = 4 if res_scale is None else 6
    row_bytes = _padded_bytes((1, nlanes), jnp.float32) * n_slabs
    tr = _pick_rows(rtot, (8 * 1024 * 1024) // max(1, row_bytes))
    grid = (rtot // tr,)
    row = pl.BlockSpec((tr, nlanes), lambda i: (i, 0))
    vec = pl.BlockSpec((1, nlanes), lambda i: (0, 0))

    if res_scale is None:
        kernel = functools.partial(_bn_res_act_kernel, slope=slope)
        in_specs = [row, vec, vec, row]
        args = (x2d, scf, bsf, r2d)
    else:
        kernel = functools.partial(_bn_bn_res_act_kernel, slope=slope)
        in_specs = [row, vec, vec, row, vec, vec]
        args = (x2d, scf, bsf, r2d,
                jnp.tile(res_scale, (1, wo)).astype(jnp.float32),
                jnp.tile(res_bias, (1, wo)).astype(jnp.float32))

    working = 3 * 2 * _padded_bytes((tr, nlanes), jnp.float32)
    out = pl.pallas_call(
        kernel,
        out_shape=jax.ShapeDtypeStruct((rtot, nlanes), jnp.float32),
        grid=grid,
        in_specs=in_specs,
        out_specs=row,
        compiler_params=_compiler_params(working),
    )(*args)
    return out


# ------------------------------ ResBlock forward ----------------------------

@functools.partial(jax.jit, static_argnames=("stride",))
def resblock_forward(x_nchw, params, stride):
    x = jnp.transpose(x_nchw, (0, 2, 3, 1)).astype(jnp.float32)     # NCHW->NHWC
    n, h, w, cin = x.shape
    cout = params["w1"].shape[0]
    ho, wo = h // stride, w // stride
    count = n * ho * wo
    xbf = x.astype(jnp.bfloat16)

    # conv1 (+ fused BN1 batch statistics)
    y1, s1, q1 = conv3x3_stats(xbf, params["w1"], stride)
    sc1, b1 = _bn_scale_bias(_reduce_stats(s1, wo, cout),
                             _reduce_stats(q1, wo, cout),
                             count, params["g1"], params["b1"])

    # conv2, with BN1-affine + LeakyReLU fused on its input (+ BN2 statistics)
    y1_nhwc = y1.reshape(n, ho, wo, cout)                            # free
    y2, s2, q2 = conv3x3_stats(y1_nhwc, params["w2"], 1,
                               pre_scale=sc1, pre_bias=b1)
    sc2, b2 = _bn_scale_bias(_reduce_stats(s2, wo, cout),
                             _reduce_stats(q2, wo, cout),
                             count, params["g2"], params["b2"])

    # shortcut + final fused BN2 (+ shortcut BN) + residual add + LeakyReLU
    if "ws" in params:
        ys, ss, qs = conv1x1_stats(xbf, params["ws"], stride)
        scs, bs = _bn_scale_bias(_reduce_stats(ss, wo, cout),
                                 _reduce_stats(qs, wo, cout),
                                 count, params["gs"], params["bs"])
        out2d = bn_residual_act(y2, sc2, b2, ys, wo=wo,
                                res_scale=scs, res_bias=bs)
    else:
        out2d = bn_residual_act(y2, sc2, b2, xbf.reshape(n, h, w * cin), wo=wo)

    out = out2d.reshape(n, ho, wo, cout)
    return jnp.transpose(out, (0, 3, 1, 2))                          # NHWC->NCHW


def init_params(key, cin, cout, stride):
    k1, k2, k3 = jax.random.split(key, 3)
    p = {
        "w1": jax.random.normal(k1, (cout, cin, 3, 3), jnp.float32) * 0.1,
        "g1": jnp.ones((cout,), jnp.float32),
        "b1": jnp.zeros((cout,), jnp.float32),
        "w2": jax.random.normal(k2, (cout, cout, 3, 3), jnp.float32) * 0.1,
        "g2": jnp.ones((cout,), jnp.float32),
        "b2": jnp.zeros((cout,), jnp.float32),
    }
    if stride != 1 or cin != cout:
        p["ws"] = jax.random.normal(k3, (cout, cin, 1, 1), jnp.float32) * 0.1
        p["gs"] = jnp.ones((cout,), jnp.float32)
        p["bs"] = jnp.zeros((cout,), jnp.float32)
    return p


# ------------------------------ pure-JAX reference --------------------------

def _ref_resblock(x, params, stride, conv_dtype=jnp.float32):
    def conv(x, w, s, pad):
        return lax.conv_general_dilated(
            x.astype(conv_dtype), w.astype(conv_dtype), (s, s),
            [(pad, pad), (pad, pad)],
            dimension_numbers=("NCHW", "OIHW", "NCHW"),
            preferred_element_type=jnp.float32)

    def bn(x, g, b):
        mean = jnp.mean(x, axis=(0, 2, 3), keepdims=True)
        var = jnp.var(x, axis=(0, 2, 3), keepdims=True)
        return ((x - mean) * lax.rsqrt(var + EPS) * g.reshape(1, -1, 1, 1)
                + b.reshape(1, -1, 1, 1))

    def lrelu(x):
        return jnp.where(x > 0, x, SLOPE * x)

    out = lrelu(bn(conv(x, params["w1"], stride, 1), params["g1"], params["b1"]))
    out = bn(conv(out, params["w2"], 1, 1), params["g2"], params["b2"])
    if "ws" in params:
        sc = bn(conv(x, params["ws"], stride, 0), params["gs"], params["bs"])
    else:
        sc = x
    return lrelu(out + sc)


# ------------------------------------ main -----------------------------------

if __name__ == "__main__":
    key = jax.random.PRNGKey(0)
    kx1, kx2, kp1, kp2 = jax.random.split(key, 4)

    # Case 1: channel change + stride=2 -> conv1x1 + BN shortcut path
    x1 = jax.random.normal(kx1, (2, 4, 16, 16), jnp.float32)
    p1 = init_params(kp1, 4, 8, 2)
    out1 = resblock_forward(x1, p1, stride=2)
    jax.block_until_ready(out1)
    assert out1.shape == (2, 8, 8, 8)
    ref1b = _ref_resblock(x1, p1, 2, conv_dtype=jnp.bfloat16)
    ref1f = _ref_resblock(x1, p1, 2, conv_dtype=jnp.float32)
    assert jnp.allclose(out1, ref1b, atol=2e-2, rtol=2e-2), \
        float(jnp.max(jnp.abs(out1 - ref1b)))
    assert jnp.allclose(out1, ref1f, atol=5e-2, rtol=5e-2), \
        float(jnp.max(jnp.abs(out1 - ref1f)))

    # Case 2: identity shortcut (stride=1, same channels)
    x2 = jax.random.normal(kx2, (2, 8, 16, 16), jnp.float32)
    p2 = init_params(kp2, 8, 8, 1)
    out2 = resblock_forward(x2, p2, stride=1)
    jax.block_until_ready(out2)
    assert out2.shape == (2, 8, 16, 16)
    ref2b = _ref_resblock(x2, p2, 1, conv_dtype=jnp.bfloat16)
    ref2f = _ref_resblock(x2, p2, 1, conv_dtype=jnp.float32)
    assert jnp.allclose(out2, ref2b, atol=2e-2, rtol=2e-2), \
        float(jnp.max(jnp.abs(out2 - ref2b)))
    assert jnp.allclose(out2, ref2f, atol=5e-2, rtol=5e-2), \
        float(jnp.max(jnp.abs(out2 - ref2f)))

    print("KERNEL_OK")
</pallas_src>

<mosaic_0001>
module attributes {stable_mosaic.version = 11 : i64} {
  func.func @_conv3x3_kernel(%arg0: i32, %arg1: memref<1x4x9x36xbf16, #tpu.memory_space<vmem>>, %arg2: memref<6x36x64xbf16, #tpu.memory_space<vmem>>, %arg3: memref<1x8x64xbf16, #tpu.memory_space<vmem>>, %arg4: memref<1x1x64xf32, #tpu.memory_space<vmem>>, %arg5: memref<1x1x64xf32, #tpu.memory_space<vmem>>) attributes {dimension_semantics = [#tpu.dimension_semantics<parallel>], iteration_bounds = array<i64: 2>, scalar_prefetch = 0 : i64, scratch_operands = 0 : i64, tpu.core_type = #tpu.core_type<tc>, window_params = [{transform_indices = @transform_0, window_bounds = array<i64: 1, 4, 9, 36>}, {pipeline_mode = #tpu.pipeline_mode<synchronous>, transform_indices = @transform_1, window_bounds = array<i64: 6, 36, 64>}, {transform_indices = @transform_2, window_bounds = array<i64: 1, 8, 64>}, {transform_indices = @transform_3, window_bounds = array<i64: 1, 1, 64>}, {transform_indices = @transform_4, window_bounds = array<i64: 1, 1, 64>}]} {
    %cst = arith.constant 0.000000e+00 : f32
    %0 = vector.broadcast %cst : f32 to vector<8x64xf32>
    %c0 = arith.constant 0 : index
    %c0_0 = arith.constant 0 : index
    %c0_1 = arith.constant 0 : index
    %c0_2 = arith.constant 0 : index
    %1 = vector.load %arg1[%c0, %c0_0, %c0_1, %c0_2] : memref<1x4x9x36xbf16, #tpu.memory_space<vmem>>, vector<1x1x8x36xbf16>
    %2 = vector.shape_cast %1 : vector<1x1x8x36xbf16> to vector<8x36xbf16>
    %c0_3 = arith.constant 0 : index
    %c0_4 = arith.constant 0 : index
    %c0_5 = arith.constant 0 : index
    %3 = vector.load %arg2[%c0_3, %c0_4, %c0_5] : memref<6x36x64xbf16, #tpu.memory_space<vmem>>, vector<1x36x64xbf16>
    %4 = vector.shape_cast %3 : vector<1x36x64xbf16> to vector<36x64xbf16>
    %cst_6 = arith.constant dense<0.000000e+00> : vector<8x64xf32>
    %5 = tpu.matmul %2, %4, %cst_6 {dimension_numbers = #tpu.dot_dimension_numbers<[1], [0], [0], [1], [0, 0, 1, 1], [], []>} : vector<8x36xbf16>, vector<36x64xbf16>, vector<8x64xf32> -> vector<8x64xf32>
    %6 = arith.addf %0, %5 : vector<8x64xf32>
    %c0_7 = arith.constant 0 : index
    %c1 = arith.constant 1 : index
    %c0_8 = arith.constant 0 : index
    %c0_9 = arith.constant 0 : index
    %7 = vector.load %arg1[%c0_7, %c1, %c0_8, %c0_9] : memref<1x4x9x36xbf16, #tpu.memory_space<vmem>>, vector<1x1x8x36xbf16>
    %8 = vector.shape_cast %7 : vector<1x1x8x36xbf16> to vector<8x36xbf16>
    %c1_10 = arith.constant 1 : index
    %c0_11 = arith.constant 0 : index
    %c0_12 = arith.constant 0 : index
    %9 = vector.load %arg2[%c1_10, %c0_11, %c0_12] : memref<6x36x64xbf16, #tpu.memory_space<vmem>>, vector<1x36x64xbf16>
    %10 = vector.shape_cast %9 : vector<1x36x64xbf16> to vector<36x64xbf16>
    %cst_13 = arith.constant dense<0.000000e+00> : vector<8x64xf32>
    %11 = tpu.matmul %8, %10, %cst_13 {dimension_numbers = #tpu.dot_dimension_numbers<[1], [0], [0], [1], [0, 0, 1, 1], [], []>} : vector<8x36xbf16>, vector<36x64xbf16>, vector<8x64xf32> -> vector<8x64xf32>
    %12 = arith.addf %6, %11 : vector<8x64xf32>
    %c0_14 = arith.constant 0 : index
    %c2 = arith.constant 2 : index
    %c0_15 = arith.constant 0 : index
    %c0_16 = arith.constant 0 : index
    %13 = vector.load %arg1[%c0_14, %c2, %c0_15, %c0_16] : memref<1x4x9x36xbf16, #tpu.memory_space<vmem>>, vector<1x1x8x36xbf16>
    %14 = vector.shape_cast %13 : vector<1x1x8x36xbf16> to vector<8x36xbf16>
    %c2_17 = arith.constant 2 : index
    %c0_18 = arith.constant 0 : index
    %c0_19 = arith.constant 0 : index
    %15 = vector.load %arg2[%c2_17, %c0_18, %c0_19] : memref<6x36x64xbf16, #tpu.memory_space<vmem>>, vector<1x36x64xbf16>
    %16 = vector.shape_cast %15 : vector<1x36x64xbf16> to vector<36x64xbf16>
    %cst_20 = arith.constant dense<0.000000e+00> : vector<8x64xf32>
    %17 = tpu.matmul %14, %16, %cst_20 {dimension_numbers = #tpu.dot_dimension_numbers<[1], [0], [0], [1], [0, 0, 1, 1], [], []>} : vector<8x36xbf16>, vector<36x64xbf16>, vector<8x64xf32> -> vector<8x64xf32>
    %18 = arith.addf %12, %17 : vector<8x64xf32>
    %c0_21 = arith.constant 0 : index
    %c3 = arith.constant 3 : index
    %c0_22 = arith.constant 0 : index
    %c0_23 = arith.constant 0 : index
    %19 = vector.load %arg1[%c0_21, %c3, %c0_22, %c0_23] : memref<1x4x9x36xbf16, #tpu.memory_space<vmem>>, vector<1x1x8x36xbf16>
    %20 = vector.shape_cast %19 : vector<1x1x8x36xbf16> to vector<8x36xbf16>
    %c3_24 = arith.constant 3 : index
    %c0_25 = arith.constant 0 : index
    %c0_26 = arith.constant 0 : index
    %21 = vector.load %arg2[%c3_24, %c0_25, %c0_26] : memref<6x36x64xbf16, #tpu.memory_space<vmem>>, vector<1x36x64xbf16>
    %22 = vector.shape_cast %21 : vector<1x36x64xbf16> to vector<36x64xbf16>
    %cst_27 = arith.constant dense<0.000000e+00> : vector<8x64xf32>
    %23 = tpu.matmul %20, %22, %cst_27 {dimension_numbers = #tpu.dot_dimension_numbers<[1], [0], [0], [1], [0, 0, 1, 1], [], []>} : vector<8x36xbf16>, vector<36x64xbf16>, vector<8x64xf32> -> vector<8x64xf32>
    %24 = arith.addf %18, %23 : vector<8x64xf32>
    %c0_28 = arith.constant 0 : index
    %c0_29 = arith.constant 0 : index
    %c1_30 = arith.constant 1 : index
    %c0_31 = arith.constant 0 : index
    %25 = vector.load %arg1[%c0_28, %c0_29, %c1_30, %c0_31] : memref<1x4x9x36xbf16, #tpu.memory_space<vmem>>, vector<1x1x8x36xbf16>
    %26 = vector.shape_cast %25 : vector<1x1x8x36xbf16> to vector<8x36xbf16>
    %c4 = arith.constant 4 : index
    %c0_32 = arith.constant 0 : index
    %c0_33 = arith.constant 0 : index
    %27 = vector.load %arg2[%c4, %c0_32, %c0_33] : memref<6x36x64xbf16, #tpu.memory_space<vmem>>, vector<1x36x64xbf16>
    %28 = vector.shape_cast %27 : vector<1x36x64xbf16> to vector<36x64xbf16>
    %cst_34 = arith.constant dense<0.000000e+00> : vector<8x64xf32>
    %29 = tpu.matmul %26, %28, %cst_34 {dimension_numbers = #tpu.dot_dimension_numbers<[1], [0], [0], [1], [0, 0, 1, 1], [], []>} : vector<8x36xbf16>, vector<36x64xbf16>, vector<8x64xf32> -> vector<8x64xf32>
    %30 = arith.addf %24, %29 : vector<8x64xf32>
    %c0_35 = arith.constant 0 : index
    %c1_36 = arith.constant 1 : index
    %c1_37 = arith.constant 1 : index
    %c0_38 = arith.constant 0 : index
    %31 = vector.load %arg1[%c0_35, %c1_36, %c1_37, %c0_38] : memref<1x4x9x36xbf16, #tpu.memory_space<vmem>>, vector<1x1x8x36xbf16>
    %32 = vector.shape_cast %31 : vector<1x1x8x36xbf16> to vector<8x36xbf16>
    %c5 = arith.constant 5 : index
    %c0_39 = arith.constant 0 : index
    %c0_40 = arith.constant 0 : index
    %33 = vector.load %arg2[%c5, %c0_39, %c0_40] : memref<6x36x64xbf16, #tpu.memory_space<vmem>>, vector<1x36x64xbf16>
    %34 = vector.shape_cast %33 : vector<1x36x64xbf16> to vector<36x64xbf16>
    %cst_41 = arith.constant dense<0.000000e+00> : vector<8x64xf32>
    %35 = tpu.matmul %32, %34, %cst_41 {dimension_numbers = #tpu.dot_dimension_numbers<[1], [0], [0], [1], [0, 0, 1, 1], [], []>} : vector<8x36xbf16>, vector<36x64xbf16>, vector<8x64xf32> -> vector<8x64xf32>
    %36 = arith.addf %30, %35 : vector<8x64xf32>
    %cst_42 = arith.constant dense<0.000000e+00> : vector<64xf32>
    %37 = vector.multi_reduction <add>, %36, %cst_42 [0] : vector<8x64xf32> to vector<64xf32>
    %38 = vector.shape_cast %37 : vector<64xf32> to vector<1x64xf32>
    %c0_43 = arith.constant 0 : index
    %c0_44 = arith.constant 0 : index
    %c0_45 = arith.constant 0 : index
    %39 = vector.load %arg4[%c0_43, %c0_44, %c0_45] : memref<1x1x64xf32, #tpu.memory_space<vmem>>, vector<1x1x64xf32>
    %40 = vector.shape_cast %39 : vector<1x1x64xf32> to vector<1x64xf32>
    %41 = vector.shape_cast %38 : vector<1x64xf32> to vector<1x1x64xf32>
    tpu.vector_store %arg4[%c0_43, %c0_44, %c0_45], %41 {strides = array<i32>} : memref<1x1x64xf32, #tpu.memory_space<vmem>>, vector<1x1x64xf32>,
    %42 = arith.mulf %36, %36 : vector<8x64xf32>
    %cst_46 = arith.constant dense<0.000000e+00> : vector<64xf32>
    %43 = vector.multi_reduction <add>, %42, %cst_46 [0] : vector<8x64xf32> to vector<64xf32>
    %44 = vector.shape_cast %43 : vector<64xf32> to vector<1x64xf32>
    %c0_47 = arith.constant 0 : index
    %c0_48 = arith.constant 0 : index
    %c0_49 = arith.constant 0 : index
    %45 = vector.load %arg5[%c0_47, %c0_48, %c0_49] : memref<1x1x64xf32, #tpu.memory_space<vmem>>, vector<1x1x64xf32>
    %46 = vector.shape_cast %45 : vector<1x1x64xf32> to vector<1x64xf32>
    %47 = vector.shape_cast %44 : vector<1x64xf32> to vector<1x1x64xf32>
    tpu.vector_store %arg5[%c0_47, %c0_48, %c0_49], %47 {strides = array<i32>} : memref<1x1x64xf32, #tpu.memory_space<vmem>>, vector<1x1x64xf32>,
    %48 = arith.truncf %36 : vector<8x64xf32> to vector<8x64xbf16>
    %c0_50 = arith.constant 0 : index
    %c0_51 = arith.constant 0 : index
    %c0_52 = arith.constant 0 : index
    %49 = vector.load %arg3[%c0_50, %c0_51, %c0_52] : memref<1x8x64xbf16, #tpu.memory_space<vmem>>, vector<1x8x64xbf16>
    %50 = vector.shape_cast %49 : vector<1x8x64xbf16> to vector<8x64xbf16>
    %51 = vector.shape_cast %48 : vector<8x64xbf16> to vector<1x8x64xbf16>
    tpu.vector_store %arg3[%c0_50, %c0_51, %c0_52], %51 {strides = array<i32>} : memref<1x8x64xbf16, #tpu.memory_space<vmem>>, vector<1x8x64xbf16>,
    return
  }
  func.func @transform_0(%arg0: i32) -> (i32, i32, i32, i32) {
    %c0_i32 = arith.constant 0 : i32
    %c0_i32_0 = arith.constant 0 : i32
    %c0_i32_1 = arith.constant 0 : i32
    %c0_i32_2 = arith.constant 0 : i32
    return %arg0, %c0_i32, %c0_i32_0, %c0_i32_1 : i32, i32, i32, i32
  }
  func.func @transform_1(%arg0: i32) -> (i32, i32, i32) {
    %c0_i32 = arith.constant 0 : i32
    %c0_i32_0 = arith.constant 0 : i32
    %c0_i32_1 = arith.constant 0 : i32
    %c0_i32_2 = arith.constant 0 : i32
    return %c0_i32, %c0_i32_0, %c0_i32_1 : i32, i32, i32
  }
  func.func @transform_2(%arg0: i32) -> (i32, i32, i32) {
    %c0_i32 = arith.constant 0 : i32
    %c0_i32_0 = arith.constant 0 : i32
    %c0_i32_1 = arith.constant 0 : i32
    return %arg0, %c0_i32, %c0_i32_0 : i32, i32, i32
  }
  func.func @transform_3(%arg0: i32) -> (i32, i32, i32) {
    %c0_i32 = arith.constant 0 : i32
    %c0_i32_0 = arith.constant 0 : i32
    %c0_i32_1 = arith.constant 0 : i32
    return %arg0, %c0_i32, %c0_i32_0 : i32, i32, i32
  }
  func.func @transform_4(%arg0: i32) -> (i32, i32, i32) {
    %c0_i32 = arith.constant 0 : i32
    %c0_i32_0 = arith.constant 0 : i32
    %c0_i32_1 = arith.constant 0 : i32
    return %arg0, %c0_i32, %c0_i32_0 : i32, i32, i32
  }
}

module attributes {stable_mosaic.version = 11 : i64} {
  func.func @_conv3x3_kernel(%arg0: i32, %arg1: memref<1x8x64xbf16, #tpu.memory_space<vmem>>, %arg2: memref<3x80x64xbf16, #tpu.memory_space<vmem>>, %arg3: memref<1x64xf32, #tpu.memory_space<vmem>>, %arg4: memref<1x64xf32, #tpu.memory_space<vmem>>, %arg5: memref<1x8x64xbf16, #tpu.memory_space<vmem>>, %arg6: memref<1x1x64xf32, #tpu.memory_space<vmem>>, %arg7: memref<1x1x64xf32, #tpu.memory_space<vmem>>, %arg8: memref<10x80xbf16, #tpu.memory_space<vmem>>) attributes {dimension_semantics = [#tpu.dimension_semantics<parallel>], iteration_bounds = array<i64: 2>, scalar_prefetch = 0 : i64, scratch_operands = 1 : i64, tpu.core_type = #tpu.core_type<tc>, window_params = [{transform_indices = @transform_0, window_bounds = array<i64: 1, 8, 64>}, {pipeline_mode = #tpu.pipeline_mode<synchronous>, transform_indices = @transform_1, window_bounds = array<i64: 3, 80, 64>}, {pipeline_mode = #tpu.pipeline_mode<synchronous>, transform_indices = @transform_2, window_bounds = array<i64: 1, 64>}, {pipeline_mode = #tpu.pipeline_mode<synchronous>, transform_indices = @transform_3, window_bounds = array<i64: 1, 64>}, {transform_indices = @transform_4, window_bounds = array<i64: 1, 8, 64>}, {transform_indices = @transform_5, window_bounds = array<i64: 1, 1, 64>}, {transform_indices = @transform_6, window_bounds = array<i64: 1, 1, 64>}]} {
    %cst = arith.constant 0.000000e+00 : f32
    %0 = vector.broadcast %cst : f32 to vector<8x64xf32>
    %c0 = arith.constant 0 : index
    %c0_0 = arith.constant 0 : index
    %c0_1 = arith.constant 0 : index
    %1 = vector.load %arg1[%c0, %c0_0, %c0_1] : memref<1x8x64xbf16, #tpu.memory_space<vmem>>, vector<1x8x64xbf16>
    %2 = vector.shape_cast %1 : vector<1x8x64xbf16> to vector<8x64xbf16>
    %3 = arith.extf %2 : vector<8x64xbf16> to vector<8x64xf32>
    %c0_2 = arith.constant 0 : index
    %c0_3 = arith.constant 0 : index
    %4 = vector.load %arg3[%c0_2, %c0_3] : memref<1x64xf32, #tpu.memory_space<vmem>>, vector<1x64xf32>
    %5 = vector.broadcast %4 : vector<1x64xf32> to vector<8x64xf32>
    %6 = arith.mulf %3, %5 : vector<8x64xf32>
    %c0_4 = arith.constant 0 : index
    %c0_5 = arith.constant 0 : index
    %7 = vector.load %arg4[%c0_4, %c0_5] : memref<1x64xf32, #tpu.memory_space<vmem>>, vector<1x64xf32>
    %8 = vector.broadcast %7 : vector<1x64xf32> to vector<8x64xf32>
    %9 = arith.addf %6, %8 : vector<8x64xf32>
    %cst_6 = arith.constant 0.000000e+00 : f32
    %10 = vector.broadcast %cst_6 : f32 to vector<8x64xf32>
    %11 = arith.cmpf ogt, %9, %10 : vector<8x64xf32>
    %cst_7 = arith.constant 1.000000e-01 : f32
    %12 = vector.broadcast %cst_7 : f32 to vector<8x64xf32>
    %13 = arith.mulf %12, %9 : vector<8x64xf32>
    %14 = arith.select %11, %9, %13 : vector<8x64xi1>, vector<8x64xf32>
    %15 = arith.truncf %14 : vector<8x64xf32> to vector<8x64xbf16>
    %cst_8 = arith.constant 0.000000e+00 : bf16
    %16 = vector.broadcast %cst_8 : bf16 to vector<10x80xbf16>
    %c0_9 = arith.constant 0 : index
    %c0_10 = arith.constant 0 : index
    %17 = vector.load %arg8[%c0_9, %c0_10] : memref<10x80xbf16, #tpu.memory_space<vmem>>, vector<10x80xbf16>
    tpu.vector_store %arg8[%c0_9, %c0_10], %16 {strides = array<i32>} : memref<10x80xbf16, #tpu.memory_space<vmem>>, vector<10x80xbf16>,
    %c1 = arith.constant 1 : index
    %c8 = arith.constant 8 : index
    %18 = vector.load %arg8[%c1, %c8] : memref<10x80xbf16, #tpu.memory_space<vmem>>, vector<8x64xbf16>
    tpu.vector_store %arg8[%c1, %c8], %15 {strides = array<i32>} : memref<10x80xbf16, #tpu.memory_space<vmem>>, vector<8x64xbf16>,
    %c0_11 = arith.constant 0 : index
    %c0_12 = arith.constant 0 : index
    %19 = vector.load %arg8[%c0_11, %c0_12] : memref<10x80xbf16, #tpu.memory_space<vmem>>, vector<8x80xbf16>
    %c0_13 = arith.constant 0 : index
    %c0_14 = arith.constant 0 : index
    %c0_15 = arith.constant 0 : index
    %20 = vector.load %arg2[%c0_13, %c0_14, %c0_15] : memref<3x80x64xbf16, #tpu.memory_space<vmem>>, vector<1x80x64xbf16>
    %21 = vector.shape_cast %20 : vector<1x80x64xbf16> to vector<80x64xbf16>
    %cst_16 = arith.constant dense<0.000000e+00> : vector<8x64xf32>
    %22 = tpu.matmul %19, %21, %cst_16 {dimension_numbers = #tpu.dot_dimension_numbers<[1], [0], [0], [1], [0, 0, 1, 1], [], []>} : vector<8x80xbf16>, vector<80x64xbf16>, vector<8x64xf32> -> vector<8x64xf32>
    %23 = arith.addf %0, %22 : vector<8x64xf32>
    %c1_17 = arith.constant 1 : index
    %c0_18 = arith.constant 0 : index
    %24 = vector.load %arg8[%c1_17, %c0_18] : memref<10x80xbf16, #tpu.memory_space<vmem>>, vector<8x80xbf16>
    %c1_19 = arith.constant 1 : index
    %c0_20 = arith.constant 0 : index
    %c0_21 = arith.constant 0 : index
    %25 = vector.load %arg2[%c1_19, %c0_20, %c0_21] : memref<3x80x64xbf16, #tpu.memory_space<vmem>>, vector<1x80x64xbf16>
    %26 = vector.shape_cast %25 : vector<1x80x64xbf16> to vector<80x64xbf16>
    %cst_22 = arith.constant dense<0.000000e+00> : vector<8x64xf32>
    %27 = tpu.matmul %24, %26, %cst_22 {dimension_numbers = #tpu.dot_dimension_numbers<[1], [0], [0], [1], [0, 0, 1, 1], [], []>} : vector<8x80xbf16>, vector<80x64xbf16>, vector<8x64xf32> -> vector<8x64xf32>
    %28 = arith.addf %23, %27 : vector<8x64xf32>
    %c2 = arith.constant 2 : index
    %c0_23 = arith.constant 0 : index
    %29 = vector.load %arg8[%c2, %c0_23] : memref<10x80xbf16, #tpu.memory_space<vmem>>, vector<8x80xbf16>
    %c2_24 = arith.constant 2 : index
    %c0_25 = arith.constant 0 : index
    %c0_26 = arith.constant 0 : index
    %30 = vector.load %arg2[%c2_24, %c0_25, %c0_26] : memref<3x80x64xbf16, #tpu.memory_space<vmem>>, vector<1x80x64xbf16>
    %31 = vector.shape_cast %30 : vector<1x80x64xbf16> to vector<80x64xbf16>
    %cst_27 = arith.constant dense<0.000000e+00> : vector<8x64xf32>
    %32 = tpu.matmul %29, %31, %cst_27 {dimension_numbers = #tpu.dot_dimension_numbers<[1], [0], [0], [1], [0, 0, 1, 1], [], []>} : vector<8x80xbf16>, vector<80x64xbf16>, vector<8x64xf32> -> vector<8x64xf32>
    %33 = arith.addf %28, %32 : vector<8x64xf32>
    %cst_28 = arith.constant dense<0.000000e+00> : vector<64xf32>
    %34 = vector.multi_reduction <add>, %33, %cst_28 [0] : vector<8x64xf32> to vector<64xf32>
    %35 = vector.shape_cast %34 : vector<64xf32> to vector<1x64xf32>
    %c0_29 = arith.constant 0 : index
    %c0_30 = arith.constant 0 : index
    %c0_31 = arith.constant 0 : index
    %36 = vector.load %arg6[%c0_29, %c0_30, %c0_31] : memref<1x1x64xf32, #tpu.memory_space<vmem>>, vector<1x1x64xf32>
    %37 = vector.shape_cast %36 : vector<1x1x64xf32> to vector<1x64xf32>
    %38 = vector.shape_cast %35 : vector<1x64xf32> to vector<1x1x64xf32>
    tpu.vector_store %arg6[%c0_29, %c0_30, %c0_31], %38 {strides = array<i32>} : memref<1x1x64xf32, #tpu.memory_space<vmem>>, vector<1x1x64xf32>,
    %39 = arith.mulf %33, %33 : vector<8x64xf32>
    %cst_32 = arith.constant dense<0.000000e+00> : vector<64xf32>
    %40 = vector.multi_reduction <add>, %39, %cst_32 [0] : vector<8x64xf32> to vector<64xf32>
    %41 = vector.shape_cast %40 : vector<64xf32> to vector<1x64xf32>
    %c0_33 = arith.constant 0 : index
    %c0_34 = arith.constant 0 : index
    %c0_35 = arith.constant 0 : index
    %42 = vector.load %arg7[%c0_33, %c0_34, %c0_35] : memref<1x1x64xf32, #tpu.memory_space<vmem>>, vector<1x1x64xf32>
    %43 = vector.shape_cast %42 : vector<1x1x64xf32> to vector<1x64xf32>
    %44 = vector.shape_cast %41 : vector<1x64xf32> to vector<1x1x64xf32>
    tpu.vector_store %arg7[%c0_33, %c0_34, %c0_35], %44 {strides = array<i32>} : memref<1x1x64xf32, #tpu.memory_space<vmem>>, vector<1x1x64xf32>,
    %45 = arith.truncf %33 : vector<8x64xf32> to vector<8x64xbf16>
    %c0_36 = arith.constant 0 : index
    %c0_37 = arith.constant 0 : index
    %c0_38 = arith.constant 0 : index
    %46 = vector.load %arg5[%c0_36, %c0_37, %c0_38] : memref<1x8x64xbf16, #tpu.memory_space<vmem>>, vector<1x8x64xbf16>
    %47 = vector.shape_cast %46 : vector<1x8x64xbf16> to vector<8x64xbf16>
    %48 = vector.shape_cast %45 : vector<8x64xbf16> to vector<1x8x64xbf16>
    tpu.vector_store %arg5[%c0_36, %c0_37, %c0_38], %48 {strides = array<i32>} : memref<1x8x64xbf16, #tpu.memory_space<vmem>>, vector<1x8x64xbf16>,
    return
  }
  func.func @transform_0(%arg0: i32) -> (i32, i32, i32) {
    %c0_i32 = arith.constant 0 : i32
    %c0_i32_0 = arith.constant 0 : i32
    %c0_i32_1 = arith.constant 0 : i32
    return %arg0, %c0_i32, %c0_i32_0 : i32, i32, i32
  }
  func.func @transform_1(%arg0: i32) -> (i32, i32, i32) {
    %c0_i32 = arith.constant 0 : i32
    %c0_i32_0 = arith.constant 0 : i32
    %c0_i32_1 = arith.constant 0 : i32
    %c0_i32_2 = arith.constant 0 : i32
    return %c0_i32, %c0_i32_0, %c0_i32_1 : i32, i32, i32
  }
  func.func @transform_2(%arg0: i32) -> (i32, i32) {
    %c0_i32 = arith.constant 0 : i32
    %c0_i32_0 = arith.constant 0 : i32
    %c0_i32_1 = arith.constant 0 : i32
    return %c0_i32, %c0_i32_0 : i32, i32
  }
  func.func @transform_3(%arg0: i32) -> (i32, i32) {
    %c0_i32 = arith.constant 0 : i32
    %c0_i32_0 = arith.constant 0 : i32
    %c0_i32_1 = arith.constant 0 : i32
    return %c0_i32, %c0_i32_0 : i32, i32
  }
  func.func @transform_4(%arg0: i32) -> (i32, i32, i32) {
    %c0_i32 = arith.constant 0 : i32
    %c0_i32_0 = arith.constant 0 : i32
    %c0_i32_1 = arith.constant 0 : i32
    return %arg0, %c0_i32, %c0_i32_0 : i32, i32, i32
  }
  func.func @transform_5(%arg0: i32) -> (i32, i32, i32) {
    %c0_i32 = arith.constant 0 : i32
    %c0_i32_0 = arith.constant 0 : i32
    %c0_i32_1 = arith.constant 0 : i32
    return %arg0, %c0_i32, %c0_i32_0 : i32, i32, i32
  }
  func.func @transform_6(%arg0: i32) -> (i32, i32, i32) {
    %c0_i32 = arith.constant 0 : i32
    %c0_i32_0 = arith.constant 0 : i32
    %c0_i32_1 = arith.constant 0 : i32
    return %arg0, %c0_i32, %c0_i32_0 : i32, i32, i32
  }
}

module attributes {stable_mosaic.version = 11 : i64} {
  func.func @_bn_bn_res_act_kernel(%arg0: i32, %arg1: memref<16x64xbf16, #tpu.memory_space<vmem>>, %arg2: memref<1x64xf32, #tpu.memory_space<vmem>>, %arg3: memref<1x64xf32, #tpu.memory_space<vmem>>, %arg4: memref<16x64xbf16, #tpu.memory_space<vmem>>, %arg5: memref<1x64xf32, #tpu.memory_space<vmem>>, %arg6: memref<1x64xf32, #tpu.memory_space<vmem>>, %arg7: memref<16x64xf32, #tpu.memory_space<vmem>>) attributes {dimension_semantics = [#tpu.dimension_semantics<parallel>], iteration_bounds = array<i64: 1>, scalar_prefetch = 0 : i64, scratch_operands = 0 : i64, tpu.core_type = #tpu.core_type<tc>, window_params = [{transform_indices = @transform_0, window_bounds = array<i64: 16, 64>}, {pipeline_mode = #tpu.pipeline_mode<synchronous>, transform_indices = @transform_1, window_bounds = array<i64: 1, 64>}, {pipeline_mode = #tpu.pipeline_mode<synchronous>, transform_indices = @transform_2, window_bounds = array<i64: 1, 64>}, {transform_indices = @transform_3, window_bounds = array<i64: 16, 64>}, {pipeline_mode = #tpu.pipeline_mode<synchronous>, transform_indices = @transform_4, window_bounds = array<i64: 1, 64>}, {pipeline_mode = #tpu.pipeline_mode<synchronous>, transform_indices = @transform_5, window_bounds = array<i64: 1, 64>}, {transform_indices = @transform_6, window_bounds = array<i64: 16, 64>}]} {
    %c0 = arith.constant 0 : index
    %c0_0 = arith.constant 0 : index
    %0 = vector.load %arg1[%c0, %c0_0] : memref<16x64xbf16, #tpu.memory_space<vmem>>, vector<16x64xbf16>
    %1 = arith.extf %0 : vector<16x64xbf16> to vector<16x64xf32>
    %c0_1 = arith.constant 0 : index
    %c0_2 = arith.constant 0 : index
    %2 = vector.load %arg2[%c0_1, %c0_2] : memref<1x64xf32, #tpu.memory_space<vmem>>, vector<1x64xf32>
    %3 = vector.broadcast %2 : vector<1x64xf32> to vector<16x64xf32>
    %4 = arith.mulf %1, %3 : vector<16x64xf32>
    %c0_3 = arith.constant 0 : index
    %c0_4 = arith.constant 0 : index
    %5 = vector.load %arg3[%c0_3, %c0_4] : memref<1x64xf32, #tpu.memory_space<vmem>>, vector<1x64xf32>
    %6 = vector.broadcast %5 : vector<1x64xf32> to vector<16x64xf32>
    %7 = arith.addf %4, %6 : vector<16x64xf32>
    %c0_5 = arith.constant 0 : index
    %c0_6 = arith.constant 0 : index
    %8 = vector.load %arg4[%c0_5, %c0_6] : memref<16x64xbf16, #tpu.memory_space<vmem>>, vector<16x64xbf16>
    %9 = arith.extf %8 : vector<16x64xbf16> to vector<16x64xf32>
    %c0_7 = arith.constant 0 : index
    %c0_8 = arith.constant 0 : index
    %10 = vector.load %arg5[%c0_7, %c0_8] : memref<1x64xf32, #tpu.memory_space<vmem>>, vector<1x64xf32>
    %11 = vector.broadcast %10 : vector<1x64xf32> to vector<16x64xf32>
    %12 = arith.mulf %9, %11 : vector<16x64xf32>
    %13 = arith.addf %7, %12 : vector<16x64xf32>
    %c0_9 = arith.constant 0 : index
    %c0_10 = arith.constant 0 : index
    %14 = vector.load %arg6[%c0_9, %c0_10] : memref<1x64xf32, #tpu.memory_space<vmem>>, vector<1x64xf32>
    %15 = vector.broadcast %14 : vector<1x64xf32> to vector<16x64xf32>
    %16 = arith.addf %13, %15 : vector<16x64xf32>
    %cst = arith.constant 0.000000e+00 : f32
    %17 = vector.broadcast %cst : f32 to vector<16x64xf32>
    %18 = arith.cmpf ogt, %16, %17 : vector<16x64xf32>
    %cst_11 = arith.constant 1.000000e-01 : f32
    %19 = vector.broadcast %cst_11 : f32 to vector<16x64xf32>
    %20 = arith.mulf %19, %16 : vector<16x64xf32>
    %21 = arith.select %18, %16, %20 : vector<16x64xi1>, vector<16x64xf32>
    %c0_12 = arith.constant 0 : index
    %c0_13 = arith.constant 0 : index
    %22 = vector.load %arg7[%c0_12, %c0_13] : memref<16x64xf32, #tpu.memory_space<vmem>>, vector<16x64xf32>
    tpu.vector_store %arg7[%c0_12, %c0_13], %21 {strides = array<i32>} : memref<16x64xf32, #tpu.memory_space<vmem>>, vector<16x64xf32>,
    return
  }
  func.func @transform_0(%arg0: i32) -> (i32, i32) {
    %c0_i32 = arith.constant 0 : i32
    %c0_i32_0 = arith.constant 0 : i32
    return %arg0, %c0_i32 : i32, i32
  }
  func.func @transform_1(%arg0: i32) -> (i32, i32) {
    %c0_i32 = arith.constant 0 : i32
    %c0_i32_0 = arith.constant 0 : i32
    %c0_i32_1 = arith.constant 0 : i32
    return %c0_i32, %c0_i32_0 : i32, i32
  }
  func.func @transform_2(%arg0: i32) -> (i32, i32) {
    %c0_i32 = arith.constant 0 : i32
    %c0_i32_0 = arith.constant 0 : i32
    %c0_i32_1 = arith.constant 0 : i32
    return %c0_i32, %c0_i32_0 : i32, i32
  }
  func.func @transform_3(%arg0: i32) -> (i32, i32) {
    %c0_i32 = arith.constant 0 : i32
    %c0_i32_0 = arith.constant 0 : i32
    return %arg0, %c0_i32 : i32, i32
  }
  func.func @transform_4(%arg0: i32) -> (i32, i32) {
    %c0_i32 = arith.constant 0 : i32
    %c0_i32_0 = arith.constant 0 : i32
    %c0_i32_1 = arith.constant 0 : i32
    return %c0_i32, %c0_i32_0 : i32, i32
  }
  func.func @transform_5(%arg0: i32) -> (i32, i32) {
    %c0_i32 = arith.constant 0 : i32
    %c0_i32_0 = arith.constant 0 : i32
    %c0_i32_1 = arith.constant 0 : i32
    return %c0_i32, %c0_i32_0 : i32, i32
  }
  func.func @transform_6(%arg0: i32) -> (i32, i32) {
    %c0_i32 = arith.constant 0 : i32
    %c0_i32_0 = arith.constant 0 : i32
    return %arg0, %c0_i32 : i32, i32
  }
}

module attributes {stable_mosaic.version = 11 : i64} {
  func.func @_conv1x1_kernel(%arg0: i32, %arg1: memref<1x8x32xbf16, #tpu.memory_space<vmem>>, %arg2: memref<32x64xbf16, #tpu.memory_space<vmem>>, %arg3: memref<1x8x64xbf16, #tpu.memory_space<vmem>>, %arg4: memref<1x1x64xf32, #tpu.memory_space<vmem>>, %arg5: memref<1x1x64xf32, #tpu.memory_space<vmem>>) attributes {dimension_semantics = [#tpu.dimension_semantics<parallel>], iteration_bounds = array<i64: 2>, scalar_prefetch = 0 : i64, scratch_operands = 0 : i64, tpu.core_type = #tpu.core_type<tc>, window_params = [{transform_indices = @transform_0, window_bounds = array<i64: 1, 8, 32>}, {pipeline_mode = #tpu.pipeline_mode<synchronous>, transform_indices = @transform_1, window_bounds = array<i64: 32, 64>}, {transform_indices = @transform_2, window_bounds = array<i64: 1, 8, 64>}, {transform_indices = @transform_3, window_bounds = array<i64: 1, 1, 64>}, {transform_indices = @transform_4, window_bounds = array<i64: 1, 1, 64>}]} {
    %c0 = arith.constant 0 : index
    %c0_0 = arith.constant 0 : index
    %c0_1 = arith.constant 0 : index
    %0 = vector.load %arg1[%c0, %c0_0, %c0_1] : memref<1x8x32xbf16, #tpu.memory_space<vmem>>, vector<1x8x32xbf16>
    %1 = vector.shape_cast %0 : vector<1x8x32xbf16> to vector<8x32xbf16>
    %c0_2 = arith.constant 0 : index
    %c0_3 = arith.constant 0 : index
    %2 = vector.load %arg2[%c0_2, %c0_3] : memref<32x64xbf16, #tpu.memory_space<vmem>>, vector<32x64xbf16>
    %cst = arith.constant dense<0.000000e+00> : vector<8x64xf32>
    %3 = tpu.matmul %1, %2, %cst {dimension_numbers = #tpu.dot_dimension_numbers<[1], [0], [0], [1], [0, 0, 1, 1], [], []>} : vector<8x32xbf16>, vector<32x64xbf16>, vector<8x64xf32> -> vector<8x64xf32>
    %cst_4 = arith.constant dense<0.000000e+00> : vector<64xf32>
    %4 = vector.multi_reduction <add>, %3, %cst_4 [0] : vector<8x64xf32> to vector<64xf32>
    %5 = vector.shape_cast %4 : vector<64xf32> to vector<1x64xf32>
    %c0_5 = arith.constant 0 : index
    %c0_6 = arith.constant 0 : index
    %c0_7 = arith.constant 0 : index
    %6 = vector.load %arg4[%c0_5, %c0_6, %c0_7] : memref<1x1x64xf32, #tpu.memory_space<vmem>>, vector<1x1x64xf32>
    %7 = vector.shape_cast %6 : vector<1x1x64xf32> to vector<1x64xf32>
    %8 = vector.shape_cast %5 : vector<1x64xf32> to vector<1x1x64xf32>
    tpu.vector_store %arg4[%c0_5, %c0_6, %c0_7], %8 {strides = array<i32>} : memref<1x1x64xf32, #tpu.memory_space<vmem>>, vector<1x1x64xf32>,
    %9 = arith.mulf %3, %3 : vector<8x64xf32>
    %cst_8 = arith.constant dense<0.000000e+00> : vector<64xf32>
    %10 = vector.multi_reduction <add>, %9, %cst_8 [0] : vector<8x64xf32> to vector<64xf32>
    %11 = vector.shape_cast %10 : vector<64xf32> to vector<1x64xf32>
    %c0_9 = arith.constant 0 : index
    %c0_10 = arith.constant 0 : index
    %c0_11 = arith.constant 0 : index
    %12 = vector.load %arg5[%c0_9, %c0_10, %c0_11] : memref<1x1x64xf32, #tpu.memory_space<vmem>>, vector<1x1x64xf32>
    %13 = vector.shape_cast %12 : vector<1x1x64xf32> to vector<1x64xf32>
    %14 = vector.shape_cast %11 : vector<1x64xf32> to vector<1x1x64xf32>
    tpu.vector_store %arg5[%c0_9, %c0_10, %c0_11], %14 {strides = array<i32>} : memref<1x1x64xf32, #tpu.memory_space<vmem>>, vector<1x1x64xf32>,
    %15 = arith.truncf %3 : vector<8x64xf32> to vector<8x64xbf16>
    %c0_12 = arith.constant 0 : index
    %c0_13 = arith.constant 0 : index
    %c0_14 = arith.constant 0 : index
    %16 = vector.load %arg3[%c0_12, %c0_13, %c0_14] : memref<1x8x64xbf16, #tpu.memory_space<vmem>>, vector<1x8x64xbf16>
    %17 = vector.shape_cast %16 : vector<1x8x64xbf16> to vector<8x64xbf16>
    %18 = vector.shape_cast %15 : vector<8x64xbf16> to vector<1x8x64xbf16>
    tpu.vector_store %arg3[%c0_12, %c0_13, %c0_14], %18 {strides = array<i32>} : memref<1x8x64xbf16, #tpu.memory_space<vmem>>, vector<1x8x64xbf16>,
    return
  }
  func.func @transform_0(%arg0: i32) -> (i32, i32, i32) {
    %c0_i32 = arith.constant 0 : i32
    %c0_i32_0 = arith.constant 0 : i32
    %c0_i32_1 = arith.constant 0 : i32
    return %arg0, %c0_i32, %c0_i32_0 : i32, i32, i32
  }
  func.func @transform_1(%arg0: i32) -> (i32, i32) {
    %c0_i32 = arith.constant 0 : i32
    %c0_i32_0 = arith.constant 0 : i32
    %c0_i32_1 = arith.constant 0 : i32
    return %c0_i32, %c0_i32_0 : i32, i32
  }
  func.func @transform_2(%arg0: i32) -> (i32, i32, i32) {
    %c0_i32 = arith.constant 0 : i32
    %c0_i32_0 = arith.constant 0 : i32
    %c0_i32_1 = arith.constant 0 : i32
    return %arg0, %c0_i32, %c0_i32_0 : i32, i32, i32
  }
  func.func @transform_3(%arg0: i32) -> (i32, i32, i32) {
    %c0_i32 = arith.constant 0 : i32
    %c0_i32_0 = arith.constant 0 : i32
    %c0_i32_1 = arith.constant 0 : i32
    return %arg0, %c0_i32, %c0_i32_0 : i32, i32, i32
  }
  func.func @transform_4(%arg0: i32) -> (i32, i32, i32) {
    %c0_i32 = arith.constant 0 : i32
    %c0_i32_0 = arith.constant 0 : i32
    %c0_i32_1 = arith.constant 0 : i32
    return %arg0, %c0_i32, %c0_i32_0 : i32, i32, i32
  }
}

</mosaic_0001>

<bundles_post_ra>
// kernel: resblock_forward.4
= control target key start
LH: loop header
LB: loop body
LE: loop exit
PB: predicated region body
PF: predicated region fallthrough
CT: control target
= control target key end

     0   :  { %s1014_s15 = smov 0   ;;  %s1147_s0 = inlined_call_operand.vmem [shape: bf16[2,4,9,36], index: 0, kind: input, shape index: {}]   ;;  %s1148_s1 = inlined_call_operand.vmem [shape: bf16[6,36,64], index: 1, kind: input, shape index: {}]   ;;  %s1149_s2 = inlined_call_operand.vmem [shape: bf16[2,8,64], index: 2, kind: output, shape index: {0}]   ;;  %s1150_s3 = inlined_call_operand.vmem [shape: f32[2,1,64], index: 3, kind: output, shape index: {1}]   ;;  %s1151_s4 = inlined_call_operand.vmem [shape: f32[2,1,64], index: 4, kind: output, shape index: {2}]  }
   0x1 LB: > { %s781_s16 = sadd.s32 4294967295, %s985_s15   ;;  %p785_p0 = scmp.ge.s32.totalorder %s985_s15, 1  ;;  %s985_s15 = sphi %s1014_s15, %s15_s15  }
   0x2   : > { %p167_p1 = scmp.lt.s32.totalorder %s985_s15, 3 }
   0x4   : > { %p168_p2 = pnand %p785_p0, %p167_p1 }
   0x5   : > { %v959_v0 = vld [vmem:[%s1148_s1 + $0x14] sm:$0xff] (!%p168_p2)   ;;  %v987_v1 = vmov (!%p168_p2), 0.0   ;;  %v960_v2 = vld [vmem:[%s1148_s1 + $0x3c] sm:$0xff] (!%p168_p2)   ;;  %v962_v4 = vld [vmem:[%s1148_s1 + $0x44] sm:$0xff] (!%p168_p2)   ;;  %p198_p3 = scmp.lt.s32.totalorder (!%p168_p2), %s781_s16, 1  ;;  %vm247_vm0 = vcmask (!%p168_p2), 1041408  }
   0x6   : > { %171 = sbr.rel (%p168_p2) target bundleno = 272 (0x110), region = 28  ;;  %872 = vmatprep.subr.bf16.mxu1 (!%p168_p2), %v987_v1  ;;  %902 = vmatprep.subr.bf16.mxu0 (!%p168_p2), %v987_v1  ;;  %v961_v3 = vld [vmem:[%s1148_s1 + $0x1c] sm:$0xff] (!%p168_p2)   ;;  %v963_v5 = vld [vmem:[%s1148_s1 + $0x24] ss:$0 sps:$4 sm:$0x33] (!%p168_p2)   ;;  %vm988_vm1 = vmmov (!%p168_p2), 0  }
   0x7   : > { %873 = vmatpush3.bf16.msra.mxu1 (!%p168_p2), %v959_v0  ;;  %903 = vmatpush3.bf16.msra.mxu0 (!%p168_p2), %v960_v2  ;;  %v964_v6 = vld [vmem:[%s1148_s1 + $0x4c] ss:$0 sps:$4 sm:$0x33] (!%p168_p2)   ;;  %v249_v7 = vsel (!%p168_p2), %vm247_vm0, %v963_v5, 0  ;;  %vm243_vm2 = vcmask (!%p168_p2), 293888   ;;  %v965_v9 = vld [vmem:[%s1148_s1] sm:$0xff] (!%p168_p2)  }
   0x8   : > { %874 = vmatprep.subr.bf16.mxu1 (!%p168_p2), %v987_v1  ;;  %904 = vmatprep.subr.bf16.mxu0 (!%p168_p2), %v987_v1  ;;  %v449_v8 = vsel (!%p168_p2), %vm247_vm0, %v964_v6, 0  ;;  %v966_v12 = vld [vmem:[%s1148_s1 + $0x50] sm:$0xff] (!%p168_p2)   ;;  %v967_v13 = vld [vmem:[%s1148_s1 + $0x8] sm:$0xff] (!%p168_p2)   ;;  %v968_v15 = vld [vmem:[%s1148_s1 + $0x58] sm:$0xff] (!%p168_p2)   ;;  %vm656_vm3 = vcmask (!%p168_p2), 523264   ;;  %vm676_vm4 = vcmask (!%p168_p2), 519168  }
   0x9   : > { %878 = vmatprep.mubr.msk.bf16.mxu1 (!%p168_p2), %vm988_vm1, %v987_v1  ;;  %908 = vmatprep.mubr.msk.bf16.mxu0 (!%p168_p2), %vm988_vm1, %v987_v1  ;;  %v969_v14 = vld [vmem:[%s1148_s1 + $0x10] ss:$0 sps:$4 sm:$0x33] (!%p168_p2)   ;;  %v970_v16 = vld [vmem:[%s1148_s1 + $0x60] ss:$0 sps:$4 sm:$0x33] (!%p168_p2)  }
   0xa   : > { %v310_v21 = vsel (!%p168_p2), %vm247_vm0, %v969_v14, 0  ;;  %v531_v22 = vsel (!%p168_p2), %vm247_vm0, %v970_v16, 0  ;;  %v972_v25 = vld [vmem:[%s1148_s1 + $0x28] sm:$0xff] (!%p168_p2)   ;;  %v974_v28 = vld [vmem:[%s1148_s1 + $0x30] sm:$0xff] (!%p168_p2)   ;;  %vm664_vm5 = vcmask (!%p168_p2), 516096  }
   0xb   : > { %875 = vmatpush3.bf16.msra.mxu1 (!%p168_p2), %v961_v3  ;;  %905 = vmatpush3.bf16.msra.mxu0 (!%p168_p2), %v962_v4  ;;  %v973_v27 = vld [vmem:[%s1148_s1 + $0x64] sm:$0xff] (!%p168_p2)   ;;  %v975_v30 = vld [vmem:[%s1148_s1 + $0x6c] sm:$0xff] (!%p168_p2)   ;;  %v976_v31 = vld [vmem:[%s1148_s1 + $0x38] ss:$0 sps:$4 sm:$0x33] (!%p168_p2)  }
   0xc   : > { %876 = vmatprep.subr.bf16.mxu1 (!%p168_p2), %v987_v1  ;;  %906 = vmatprep.subr.bf16.mxu0 (!%p168_p2), %v987_v1  ;;  %v977_v32 = vld [vmem:[%s1148_s1 + $0x74] ss:$0 sps:$4 sm:$0x33] (!%p168_p2)   ;;  %v379_v35 = vsel (!%p168_p2), %vm247_vm0, %v976_v31, 0 }
   0xd   : > { %s1153_s16 = smov (!%p198_p3, %s781_s16), 1  ;;  %v613_v36 = vsel %vm247_vm0, %v977_v32, 0 }
   0xe   : > { %s847_s29 = sshll.u32 %s1153_s16, 5  ;;  %s788_s8 = sshll.u32 %s1153_s16, 2 }
   0xf   : > { %s1058_s6 = scalar_lea.vmem %s1147_s0, %s847_s29  ;;  %877 = vmatpush3.bf16.msra.mxu1 %v249_v7  ;;  %907 = vmatpush3.bf16.msra.mxu0 %v449_v8  ;;  %s206_s11 = scalar_lea.vmem %s1149_s2, %s788_s8 }
  0x10   : > { %v789_v10 = vld [vmem:[%s1058_s6 + $0x8] sm:$0xf]  ;;  %882 = vmatprep.subr.bf16.mxu1 %v987_v1  ;;  %v813_v11 = vld [vmem:[%s1058_s6 + $0x18] sm:$0xf]  ;;  %912 = vmatprep.subr.bf16.mxu0 %v987_v1  ;;  %v971_v17 = vld [vmem:[%s1058_s6] sm:$0x1f]   ;;  %s209_s13 = scalar_lea.vmem %s1150_s3, %s1153_s16  ;;  %s212_s18 = scalar_lea.vmem %s1151_s4, %s1153_s16 }
  0x11   : > { %v508_v18 = vshll.u32 %v971_v17, 16  ;;  %v506_v19 = vshrl.u32 %v971_v17, 16  ;;  %v214_v23 = vld [vmem:[%s1058_s6] sm:$0xf]  ;;  %v978_v26 = vld [vmem:[%s1058_s6 + $0x8] sm:$0x1f]  }
  0x12   : > { %879 = vmatmul.mubr.msk.bf16.vlgmr.msra.gmra.mrb[0].mxu1 %vm243_vm2, %v789_v10  ;;  %909 = vmatmul.mubr.msk.bf16.vlgmr.msra.gmra.mrb[0].mxu0 %vm243_vm2, %v813_v11  ;;  %v590_v29 = vshll.u32 %v978_v26, 16  ;;  %v588_v33 = vshrl.u32 %v978_v26, 16  ;;  %v803_v37 = vld [vmem:[%s1058_s6 + $0x10] sm:$0xf] }
  0x13   : > { %883 = vmatpush3.bf16.msra.mxu1 %v965_v9  ;;  %913 = vmatpush3.bf16.msra.mxu0 %v966_v12  ;;  %v510_v20 = vrot.slane %v508_v18, 1 }
  0x14   : > { %884 = vmatprep.subr.bf16.mxu1 %v987_v1  ;;  %914 = vmatprep.subr.bf16.mxu0 %v987_v1  ;;  %v592_v34 = vrot.slane %v590_v29, 1 }
  0x15   : > { %888 = vmatprep.mubr.msk.bf16.mxu1 %vm988_vm1, %v987_v1  ;;  %918 = vmatprep.mubr.msk.bf16.mxu0 %vm988_vm1, %v987_v1  ;;  %v511_v24 = vor.u32 %v510_v20, %v506_v19 }
  0x16   : > { %v593_v38 = vor.u32 %v592_v34, %v588_v33 }
  0x17   : > { %885 = vmatpush3.bf16.msra.mxu1 %v967_v13  ;;  %915 = vmatpush3.bf16.msra.mxu0 %v968_v15 }
  0x18   : > { %886 = vmatprep.subr.bf16.mxu1 %v987_v1  ;;  %916 = vmatprep.subr.bf16.mxu0 %v987_v1 }
  0x1b   : > { %887 = vmatpush3.bf16.msra.mxu1 %v310_v21  ;;  %917 = vmatpush3.bf16.msra.mxu0 %v531_v22 }
  0x1c   : > { %892 = vmatprep.subr.bf16.mxu1 %v987_v1  ;;  %922 = vmatprep.subr.bf16.mxu0 %v987_v1 }
  0x1e   : > { %889 = vmatmul.mubr.msk.bf16.vlgmr.msra.gmra.mrb[0].mxu1 %vm243_vm2, %v214_v23  ;;  %919 = vmatmul.mubr.msk.bf16.vlgmr.msra.gmra.mrb[0].mxu0 %vm243_vm2, %v511_v24 }
  0x1f   : > { %893 = vmatpush3.bf16.msra.mxu1 %v972_v25  ;;  %923 = vmatpush3.bf16.msra.mxu0 %v973_v27 }
  0x20   : > { %894 = vmatprep.subr.bf16.mxu1 %v987_v1  ;;  %924 = vmatprep.subr.bf16.mxu0 %v987_v1 }
  0x21   : > { %898 = vmatprep.mubr.msk.bf16.mxu1 %vm988_vm1, %v987_v1  ;;  %928 = vmatprep.mubr.msk.bf16.mxu0 %vm988_vm1, %v987_v1 }
  0x23   : > { %895 = vmatpush3.bf16.msra.mxu1 %v974_v28  ;;  %925 = vmatpush3.bf16.msra.mxu0 %v975_v30 }
  0x24   : > { %896 = vmatprep.subr.bf16.mxu1 %v987_v1  ;;  %926 = vmatprep.subr.bf16.mxu0 %v987_v1 }
  0x27   : > { %897 = vmatpush3.bf16.msra.mxu1 %v379_v35  ;;  %927 = vmatpush3.bf16.msra.mxu0 %v613_v36 }
  0x2a   : > { %899 = vmatmul.mubr.msk.bf16.vlgmr.msra.gmra.mrb[0].mxu1 %vm243_vm2, %v803_v37  ;;  %929 = vmatmul.mubr.msk.bf16.vlgmr.msra.gmra.mrb[0].mxu0 %vm243_vm2, %v593_v38 }
  0xfd   : > { %v415_v39 = vpop.f32.mrb[0].mxu1  ;;  %v649_v40 = vpop.f32.mrb[0].mxu0 }
  0xfe   : > { %v900_v41 = vpop.f32.mrb[1].mxu1  ;;  %v932_v42 = vadd.f32 %v649_v40, %v415_v39  ;;  %v930_v43 = vpop.f32.mrb[1].mxu0 }
  0xff   : > { %v418_v44 = vpop.f32.mrb[2].mxu1  ;;  %v652_v45 = vpop.f32.mrb[2].mxu0 }
 0x100   : > { %v901_v46 = vpop.f32.mrb[3].mxu1  ;;  %v657_v47 = vsel %vm656_vm3, %v932_v42, 0.0  ;;  %v666_v48 = vmul.f32 %v932_v42, %v932_v42  ;;  %v675_v49 = vpack.c.bf16 %v932_v42, %v932_v42  ;;  %v931_v50 = vpop.f32.mrb[3].mxu0 }
 0x101   : > { %v658_v51 = vrot.slane %v657_v47, 4 }
 0x102   : > { %v667_v52 = vsel %vm656_vm3, %v666_v48, 0.0  ;;  %677 = vst.msk [vmem:[%s206_s11] sm:$0xf] %vm676_vm4, %v675_v49 }
 0x103   : > { %v659_v53 = vadd.f32 %v658_v51, %v657_v47  ;;  %v668_v54 = vrot.slane %v667_v52, 4 }
 0x105   : > { %v660_v55 = vrot.slane %v659_v53, 2  ;;  %v669_v56 = vadd.f32 %v668_v54, %v667_v52 }
 0x107   : > { %v661_v57 = vadd.f32 %v660_v55, %v659_v53  ;;  %v670_v58 = vrot.slane %v669_v56, 2 }
 0x109   : > { %v662_v59 = vrot.slane %v661_v57, 1  ;;  %v671_v60 = vadd.f32 %v670_v58, %v669_v56 }
 0x10b   : > { %v663_v61 = vadd.f32 %v662_v59, %v661_v57  ;;  %v672_v62 = vrot.slane %v671_v60, 1 }
 0x10d   : > { %665 = vst.msk [vmem:[%s209_s13] sm:$0x1] %vm664_vm5, %v663_v61  ;;  %v673_v63 = vadd.f32 %v672_v62, %v671_v60 }
 0x10f   : > { %674 = vst.msk [vmem:[%s212_s18] sm:$0x1] %vm664_vm5, %v673_v63 }
 0x110 PF: > { %s15_s15 = sadd.s32 1, %s985_s15  }
 0x111   : > { %p12_p4 = scmp.ge.s32.totalorder %s15_s15, 4  }
 0x113   :  { %14 = sbr.rel (!%p12_p4) target bundleno = 1 (0x1), region = 90 }

// kernel: resblock_forward.5
= control target key start
LH: loop header
LB: loop body
LE: loop exit
PB: predicated region body
PF: predicated region fallthrough
CT: control target
= control target key end

     0   :  { %s911_s21 = smov 0   ;;  %s1018_s0 = inlined_call_operand.vmem [shape: bf16[2,8,64], index: 0, kind: input, shape index: {}]   ;;  %s1019_s1 = inlined_call_operand.vmem [shape: bf16[3,80,64], index: 1, kind: input, shape index: {}]   ;;  %s1020_s2 = inlined_call_operand.vmem [shape: f32[1,64], index: 2, kind: input, shape index: {}]   ;;  %s1021_s3 = inlined_call_operand.vmem [shape: f32[1,64], index: 3, kind: input, shape index: {}]   ;;  %s1022_s4 = inlined_call_operand.vmem [shape: bf16[2,8,64], index: 4, kind: output, shape index: {0}]   ;;  %s1023_s5 = inlined_call_operand.vmem [shape: f32[2,1,64], index: 5, kind: output, shape index: {1}]   ;;  %s1024_s6 = inlined_call_operand.vmem [shape: f32[2,1,64], index: 6, kind: output, shape index: {2}]  }
   0x1 LB: > { %s717_s22 = sadd.s32 4294967295, %s870_s21   ;;  %p721_p0 = scmp.ge.s32.totalorder %s870_s21, 1  ;;  %s870_s21 = sphi %s911_s21, %s17_s21  }
   0x2   : > { %p216_p1 = scmp.lt.s32.totalorder %s870_s21, 3 }
   0x4   : > { %p217_p2 = pnand %p721_p0, %p216_p1 }
   0x5   : > { %p250_p3 = scmp.lt.s32.totalorder (!%p217_p2), %s717_s22, 1  ;;  %v847_v0 = vld [vmem:[%s1019_s1] sm:$0xff] (!%p217_p2)   ;;  %v872_v1 = vmov (!%p217_p2), 0.0   ;;  %v848_v2 = vld [vmem:[%s1019_s1 + $0x8] sm:$0xff] (!%p217_p2)   ;;  %vm287_vm0 = vcmask (!%p217_p2), 650240   ;;  %v873_v4 = vmov (!%p217_p2), 0  }
   0x6   : > { %220 = sbr.rel (%p217_p2) target bundleno = 408 (0x198), region = 36  ;;  %802 = vmatprep.subr.bf16.mxu0 (!%p217_p2), %v872_v1  ;;  %788 = vmatprep.subr.bf16.mxu1 (!%p217_p2), %v872_v1  ;;  %v724_v3 = vld [vmem:[%s1020_s2] ss:$0 sm:$0xff] (!%p217_p2)  ;;  %288 = vst.msk [vmem:[#allocation2] sm:$0xf] (!%p217_p2), %vm287_vm0, %v873_v4  ;;  %v849_v8 = vld [vmem:[%s1019_s1 + $0x10] sm:$0xff] (!%p217_p2)  }
   0x7   : > { %803 = vmatpush3.bf16.msra.mxu0 (!%p217_p2), %v847_v0  ;;  %v725_v6 = vld [vmem:[%s1021_s3] ss:$0 sm:$0xff] (!%p217_p2)  ;;  %vm289_vm1 = vcmask (!%p217_p2), 647168   ;;  %v850_v10 = vld [vmem:[%s1019_s1 + $0x18] sm:$0xff] (!%p217_p2)   ;;  %v851_v12 = vld [vmem:[%s1019_s1 + $0x28] sm:$0xff] (!%p217_p2)   ;;  %vm874_vm3 = vmmov (!%p217_p2), 0  }
   0x8   : > { %804 = vmatprep.subr.bf16.mxu0 (!%p217_p2), %v872_v1  ;;  %290 = vst.msk [vmem:[#allocation2 + $0x4] sm:$0x1] (!%p217_p2), %vm289_vm1, %v873_v4  ;;  %789 = vmatpush3.bf16.msra.mxu1 (!%p217_p2), %v851_v12  ;;  %v852_v15 = vld [vmem:[%s1019_s1 + $0x20] sm:$0xff] (!%p217_p2)   ;;  %v853_v16 = vld [vmem:[%s1019_s1 + $0x30] sm:$0xff] (!%p217_p2)   ;;  %v857_v21 = vld [vmem:[%s1019_s1 + $0x38] sm:$0xff] (!%p217_p2)   ;;  %s875_s25 = smov (!%p217_p2), 8  }
   0x9   : > { %790 = vmatprep.subr.bf16.mxu1 (!%p217_p2), %v872_v1  ;;  %812 = vmatprep.mubr.msk.bf16.mxu0 (!%p217_p2), %vm874_vm3, %v872_v1  ;;  %v859_v24 = vld [vmem:[%s1019_s1 + $0x40] sm:$0xff] (!%p217_p2)   ;;  %v861_v25 = vld [vmem:[%s1019_s1 + $0x48] sm:$0xff] (!%p217_p2)   ;;  %vm308_vm4 = vcmask (!%p217_p2), 584768   ;;  %vm309_vm5 = vsmask.f32 (!%p217_p2), 7938  ;;  %vm314_vm7 = vcmask (!%p217_p2), 581696  }
   0xa   : > { %798 = vmatprep.mubr.msk.bf16.mxu1 (!%p217_p2), %vm874_vm3, %v872_v1  ;;  %vm310_vm6 = vmand (!%p217_p2), %vm308_vm4, %vm309_vm5  ;;  %vm315_vm8 = vsmask.f32 (!%p217_p2), 256  ;;  %vm385_vm10 = vcmask (!%p217_p2), 654336   ;;  %v856_v32 = vld [vmem:[%s1019_s1 + $0x50] sm:$0xff] (!%p217_p2)   ;;  %v858_v34 = vld [vmem:[%s1019_s1 + $0x58] sm:$0xff] (!%p217_p2)   ;;  %vm592_vm11 = vcmask (!%p217_p2), 523264  }
   0xb   : > { %805 = vmatpush3.bf16.msra.mxu0 (!%p217_p2), %v848_v2  ;;  %vm316_vm9 = vmand (!%p217_p2), %vm314_vm7, %vm315_vm8  ;;  %v860_v37 = vld [vmem:[%s1019_s1 + $0x60] sm:$0xff] (!%p217_p2)   ;;  %v862_v41 = vld [vmem:[%s1019_s1 + $0x68] sm:$0xff] (!%p217_p2)   ;;  %vm612_vm12 = vcmask (!%p217_p2), 519168   ;;  %vm600_vm13 = vcmask (!%p217_p2), 516096  }
   0xc   : > { %806 = vmatprep.subr.bf16.mxu0 (!%p217_p2), %v872_v1  ;;  %791 = vmatpush3.bf16.msra.mxu1 (!%p217_p2), %v853_v16  ;;  %v863_v44 = vld [vmem:[%s1019_s1 + $0x70] sm:$0xff] (!%p217_p2)  }
   0xd   : > { %s1026_s22 = smov (!%p250_p3, %s717_s22), 1  ;;  %792 = vmatprep.subr.bf16.mxu1 %v872_v1  ;;  %v311_v26 = vld [vmem:[#allocation2] sm:$0xf] }
   0xe   : > { %s722_s27 = sshll.u32 %s1026_s22, 2  ;;  %s260_s23 = scalar_lea.vmem %s1023_s5, %s1026_s22 }
   0xf   : > { %s253_s30 = scalar_lea.vmem %s1018_s0, %s722_s27  ;;  %807 = vmatpush3.bf16.msra.mxu0 %v849_v8  ;;  %v317_v29 = vld [vmem:[#allocation2 + $0x4] sm:$0x1]  ;;  %s257_s19 = scalar_lea.vmem %s1022_s4, %s722_s27 }
  0x10   : > { %v265_v5 = vld [vmem:[%s253_s30] sm:$0xf]  ;;  %808 = vmatprep.subr.bf16.mxu0 %v872_v1  ;;  %793 = vmatpush3.bf16.msra.mxu1 %v857_v21  ;;  %s263_s26 = scalar_lea.vmem %s1024_s6, %s1026_s22 }
  0x11   : > { %v266_v7 = vunpack.c.l.bf16 %v265_v5  ;;  %794 = vmatprep.subr.bf16.mxu1 %v872_v1 }
  0x13   : > { %v274_v9 = vmul.f32 %v724_v3, %v266_v7  ;;  %809 = vmatpush3.bf16.msra.mxu0 %v850_v10 }
  0x14   : > { %810 = vmatprep.subr.bf16.mxu0 %v872_v1  ;;  %795 = vmatpush3.bf16.msra.mxu1 %v859_v24 }
  0x15   : > { %v282_v11 = vadd.f32 %v725_v6, %v274_v9  ;;  %796 = vmatprep.subr.bf16.mxu1 %v872_v1 }
  0x17   : > { %vm283_vm2 = vcmp.gt.f32.partialorder %v282_v11, 0.0  ;;  %v284_v13 = vmul.f32 0.1, %v282_v11  ;;  %811 = vmatpush3.bf16.msra.mxu0 %v852_v15 }
  0x18   : > { %816 = vmatprep.subr.bf16.mxu0 %v872_v1  ;;  %797 = vmatpush3.bf16.msra.mxu1 %v861_v25 }
  0x19   : > { %v285_v14 = vsel %vm283_vm2, %v282_v11, %v284_v13 }
  0x1a   : > { %v769_v17 = vpack.c.bf16 %v285_v14, %v285_v14 }
  0x1c   : > { %v295_v18 = vshrl.u32 %v769_v17, 16  ;;  %v298_v19 = vshll.u32 %v769_v17, 16 }
  0x1e   : > { %v297_v20 = vrot.slane %v295_v18, 7 }
  0x20   : > { %v300_v22 = vor.u32 %v298_v19, %v297_v20  ;;  %v301_v23 = vrot.slane %v297_v20, 4 }
  0x22   : > { %302 = vrot.lane.b32.xlu0 %v300_v22, %s875_s25 }
  0x26   : > { %304 = vrot.lane.b32.xlu0 %v301_v23, %s875_s25 }
  0x94   : > { %v303_v27 = vpop.permute.xlu0 %302 }
  0x95   : > { %v312_v28 = vsel %vm310_vm6, %v303_v27, %v311_v26 }
  0x96   : > { %313 = vst [vmem:[#allocation2] sm:$0xf] %v312_v28 }
  0x98   : > { %v305_v30 = vpop.permute.xlu0 %304 }
  0x99   : > { %v318_v31 = vsel %vm316_vm9, %v305_v30, %v317_v29 }
  0x9a   : > { %319 = vst [vmem:[#allocation2 + $0x4] sm:$0x1] %v318_v31 }
  0x9d   : > { %v320_v33 = vld [vmem:[#allocation2] sm:$0xf] }
  0x9e   : > { %813 = vmatmul.mubr.msk.bf16.vlgmr.msra.gmra.mrb[0].mxu0 %vm385_vm10, %v320_v33  ;;  %v502_v43 = vld [vmem:[#allocation2] sm:$0xe] }
  0x9f   : > { %817 = vmatpush3.bf16.msra.mxu0 %v856_v32  ;;  %826 = vmatprep.mubr.msk.bf16.mxu0 %vm874_vm3, %v872_v1 }
  0xa0   : > { %818 = vmatprep.subr.bf16.mxu0 %v872_v1 }
  0xa1   : > { %v331_v35 = vld [vmem:[#allocation2 + $0x4] sm:$0x1] }
  0xa2   : > { %v737_v36 = vcombine.low %v320_v33, %v331_v35  ;;  %v760_v45 = vcombine.low %v502_v43, %v331_v35 }
  0xa3   : > { %819 = vmatpush3.bf16.msra.mxu0 %v858_v34 }
  0xa4   : > { %v351_v38 = vshll.u32 %v737_v36, 16  ;;  %820 = vmatprep.subr.bf16.mxu0 %v872_v1  ;;  %v349_v39 = vshrl.u32 %v737_v36, 16  ;;  %v517_v46 = vrot.slane %v760_v45, 1 }
  0xa6   : > { %v353_v40 = vrot.slane %v351_v38, 1 }
  0xa7   : > { %821 = vmatpush3.bf16.msra.mxu0 %v860_v37 }
  0xa8   : > { %822 = vmatprep.subr.bf16.mxu0 %v872_v1  ;;  %v354_v42 = vor.u32 %v353_v40, %v349_v39 }
  0xaa   : > { %799 = vmatmul.mubr.msk.bf16.vlgmr.msra.gmra.mrb[0].mxu1 %vm385_vm10, %v354_v42 }
  0xab   : > { %823 = vmatpush3.bf16.msra.mxu0 %v862_v41 }
  0xac   : > { %824 = vmatprep.subr.bf16.mxu0 %v872_v1 }
  0xaf   : > { %825 = vmatpush3.bf16.msra.mxu0 %v863_v44 }
  0xb2   : > { %827 = vmatmul.mubr.msk.bf16.vlgmr.msra.gmra.mrb[0].mxu0 %vm385_vm10, %v517_v46 }
 0x17d   : > { %v423_v47 = vpop.f32.mrb[0].mxu1 }
 0x17e   : > { %v800_v48 = vpop.f32.mrb[1].mxu1 }
 0x17f   : > { %v426_v49 = vpop.f32.mrb[2].mxu1 }
 0x180   : > { %v801_v50 = vpop.f32.mrb[3].mxu1 }
 0x185   : > { %v585_v51 = vpop.f32.mrb[0].mxu0 }
 0x186   : > { %v830_v52 = vadd.f32 %v585_v51, %v423_v47  ;;  %v828_v53 = vpop.f32.mrb[1].mxu0 }
 0x187   : > { %v588_v54 = vpop.f32.mrb[2].mxu0 }
 0x188   : > { %v593_v55 = vsel %vm592_vm11, %v830_v52, 0.0  ;;  %v602_v56 = vmul.f32 %v830_v52, %v830_v52  ;;  %v611_v57 = vpack.c.bf16 %v830_v52, %v830_v52  ;;  %v829_v58 = vpop.f32.mrb[3].mxu0 }
 0x189   : > { %v594_v59 = vrot.slane %v593_v55, 4 }
 0x18a   : > { %v603_v60 = vsel %vm592_vm11, %v602_v56, 0.0  ;;  %613 = vst.msk [vmem:[%s257_s19] sm:$0xf] %vm612_vm12, %v611_v57 }
 0x18b   : > { %v595_v61 = vadd.f32 %v594_v59, %v593_v55  ;;  %v604_v62 = vrot.slane %v603_v60, 4 }
 0x18d   : > { %v596_v63 = vrot.slane %v595_v61, 2  ;;  %v605_v0 = vadd.f32 %v604_v62, %v603_v60 }
 0x18f   : > { %v597_v1 = vadd.f32 %v596_v63, %v595_v61  ;;  %v606_v2 = vrot.slane %v605_v0, 2 }
 0x191   : > { %v598_v3 = vrot.slane %v597_v1, 1  ;;  %v607_v4 = vadd.f32 %v606_v2, %v605_v0 }
 0x193   : > { %v599_v5 = vadd.f32 %v598_v3, %v597_v1  ;;  %v608_v6 = vrot.slane %v607_v4, 1 }
 0x195   : > { %601 = vst.msk [vmem:[%s260_s23] sm:$0x1] %vm600_vm13, %v599_v5  ;;  %v609_v7 = vadd.f32 %v608_v6, %v607_v4 }
 0x197   : > { %610 = vst.msk [vmem:[%s263_s26] sm:$0x1] %vm600_vm13, %v609_v7 }
 0x198 PF: > { %s17_s21 = sadd.s32 1, %s870_s21  }
 0x199   : > { %p14_p4 = scmp.ge.s32.totalorder %s17_s21, 4  }
 0x19b   :  { %16 = sbr.rel (!%p14_p4) target bundleno = 1 (0x1), region = 92 }

// kernel: resblock_forward.7
= control target key start
LH: loop header
LB: loop body
LE: loop exit
PB: predicated region body
PF: predicated region fallthrough
CT: control target
= control target key end

     0   :  { %vm75_vm0 = vcmask 523264   ;;  %s153_s0 = inlined_call_operand.vmem [shape: bf16[16,64], index: 0, kind: input, shape index: {}]   ;;  %s154_s1 = inlined_call_operand.vmem [shape: f32[1,64], index: 1, kind: input, shape index: {}]   ;;  %s155_s2 = inlined_call_operand.vmem [shape: f32[1,64], index: 2, kind: input, shape index: {}]   ;;  %s156_s3 = inlined_call_operand.vmem [shape: bf16[16,64], index: 3, kind: input, shape index: {}]   ;;  %s157_s4 = inlined_call_operand.vmem [shape: f32[1,64], index: 4, kind: input, shape index: {}]   ;;  %s158_s5 = inlined_call_operand.vmem [shape: f32[1,64], index: 5, kind: input, shape index: {}]   ;;  %s159_s6 = inlined_call_operand.vmem [shape: f32[16,64], index: 6, kind: output, shape index: {}]  }
   0x1   :  { %v87_v0 = vld [vmem:[%s153_s0] sm:$0xff]  }
   0x2   :  { %v82_v1 = vld [vmem:[%s154_s1] ss:$0 sm:$0xff]  ;;  %v88_v2 = vunpack.c.l.bf16 %v87_v0  ;;  %v89_v5 = vunpack.c.h.bf16 %v87_v0 }
   0x3   :  { %v91_v3 = vld [vmem:[%s156_s3] sm:$0xff]  }
   0x4   :  { %v84_v4 = vld [vmem:[%s157_s4] ss:$0 sm:$0xff]  ;;  %v92_v7 = vunpack.c.l.bf16 %v91_v3  ;;  %v93_v8 = vunpack.c.h.bf16 %v91_v3  ;;  %v34_v9 = vmul.f32 %v88_v2, %v82_v1  ;;  %v35_v10 = vmul.f32 %v89_v5, %v82_v1 }
   0x5   :  { %v83_v6 = vld [vmem:[%s155_s2] ss:$0 sm:$0xff] }
   0x6   :  { %v56_v11 = vmul.f32 %v92_v7, %v84_v4  ;;  %v57_v12 = vmul.f32 %v93_v8, %v84_v4  ;;  %v43_v13 = vadd.f32 %v83_v6, %v34_v9  ;;  %v44_v14 = vadd.f32 %v83_v6, %v35_v10  ;;  %v85_v15 = vld [vmem:[%s158_s5] ss:$0 sm:$0xff] }
   0x8   :  { %v58_v16 = vadd.f32 %v56_v11, %v43_v13  ;;  %v59_v17 = vadd.f32 %v57_v12, %v44_v14 }
   0xa   :  { %v67_v18 = vadd.f32 %v85_v15, %v58_v16  ;;  %v68_v19 = vadd.f32 %v85_v15, %v59_v17 }
   0xc   :  { %vm69_vm1 = vcmp.gt.f32.partialorder %v67_v18, 0.0  ;;  %v71_v20 = vmul.f32 0.1, %v67_v18  ;;  %vm70_vm2 = vcmp.gt.f32.partialorder %v68_v19, 0.0  ;;  %v72_v21 = vmul.f32 0.1, %v68_v19 }
   0xe   :  { %v73_v22 = vsel %vm69_vm1, %v67_v18, %v71_v20  ;;  %v74_v23 = vsel %vm70_vm2, %v68_v19, %v72_v21 }
   0xf   :  { %76 = vst.msk [vmem:[%s159_s6] sm:$0xff] %vm75_vm0, %v73_v22  ;;  %77 = vst.msk [vmem:[%s159_s6 + $0x8] sm:$0xff] %vm75_vm0, %v74_v23 }

// kernel: resblock_forward.6
= control target key start
LH: loop header
LB: loop body
LE: loop exit
PB: predicated region body
PF: predicated region fallthrough
CT: control target
= control target key end

     0   :  { %s467_s15 = smov 0   ;;  %s501_s0 = inlined_call_operand.vmem [shape: bf16[2,8,32], index: 0, kind: input, shape index: {}]   ;;  %s502_s1 = inlined_call_operand.vmem [shape: bf16[32,64], index: 1, kind: input, shape index: {}]   ;;  %s503_s2 = inlined_call_operand.vmem [shape: bf16[2,8,64], index: 2, kind: output, shape index: {0}]   ;;  %s504_s3 = inlined_call_operand.vmem [shape: f32[2,1,64], index: 3, kind: output, shape index: {1}]   ;;  %s505_s4 = inlined_call_operand.vmem [shape: f32[2,1,64], index: 4, kind: output, shape index: {2}]  }
   0x1 LB: > { %s397_s16 = sadd.s32 4294967295, %s438_s15   ;;  %p401_p0 = scmp.ge.s32.totalorder %s438_s15, 1  ;;  %s438_s15 = sphi %s467_s15, %s15_s15  }
   0x2   : > { %p166_p1 = scmp.lt.s32.totalorder %s438_s15, 3 }
   0x4   : > { %p167_p2 = pnand %p401_p0, %p166_p1 }
   0x5   : > { %v430_v0 = vld [vmem:[%s502_s1] sm:$0xff] (!%p167_p2)   ;;  %v440_v1 = vmov (!%p167_p2), 0.0   ;;  %v431_v2 = vld [vmem:[%s502_s1 + $0x8] sm:$0xff] (!%p167_p2)   ;;  %vm441_vm0 = vmmov (!%p167_p2), 0   ;;  %p196_p3 = scmp.lt.s32.totalorder (!%p167_p2), %s397_s16, 1  ;;  %vm228_vm1 = vcmask (!%p167_p2), 261120  }
   0x6   : > { %170 = sbr.rel (%p167_p2) target bundleno = 245 (0xf5), region = 28  ;;  %412 = vmatprep.subr.bf16.mxu0 (!%p167_p2), %v440_v1  ;;  %416 = vmatprep.mubr.msk.bf16.mxu0 (!%p167_p2), %vm441_vm0, %v440_v1  ;;  %vm272_vm2 = vcmask (!%p167_p2), 523264   ;;  %vm292_vm3 = vcmask (!%p167_p2), 519168   ;;  %vm280_vm4 = vcmask (!%p167_p2), 516096  }
   0x7   : > { %413 = vmatpush3.bf16.msra.mxu0 (!%p167_p2), %v430_v0 }
   0x8   : > { %414 = vmatprep.subr.bf16.mxu0 (!%p167_p2), %v440_v1 }
   0xb   : > { %415 = vmatpush3.bf16.msra.mxu0 (!%p167_p2), %v431_v2 }
   0xd   : > { %s507_s16 = smov (!%p196_p3, %s397_s16), 1 }
   0xe   : > { %s402_s21 = sshll.u32 %s507_s16, 2  ;;  %s206_s30 = scalar_lea.vmem %s504_s3, %s507_s16 }
   0xf   : > { %s199_s24 = scalar_lea.vmem %s501_s0, %s402_s21  ;;  %s203_s27 = scalar_lea.vmem %s503_s2, %s402_s21 }
  0x10   : > { %v211_v3 = vld [vmem:[%s199_s24] sm:$0xf]  ;;  %s209_s7 = scalar_lea.vmem %s505_s4, %s507_s16 }
  0x11   : > { %417 = vmatmul.mubr.msk.bf16.vlgmr.msra.gmra.mrb[0].mxu0 %vm228_vm1, %v211_v3 }
  0xe4   : > { %v266_v4 = vpop.f32.mrb[0].mxu0 }
  0xe5   : > { %v273_v5 = vsel %vm272_vm2, %v266_v4, 0.0  ;;  %v282_v6 = vmul.f32 %v266_v4, %v266_v4  ;;  %v291_v7 = vpack.c.bf16 %v266_v4, %v266_v4  ;;  %v418_v8 = vpop.f32.mrb[1].mxu0 }
  0xe6   : > { %v274_v9 = vrot.slane %v273_v5, 4  ;;  %v269_v10 = vpop.f32.mrb[2].mxu0 }
  0xe7   : > { %v283_v11 = vsel %vm272_vm2, %v282_v6, 0.0  ;;  %293 = vst.msk [vmem:[%s203_s27] sm:$0xf] %vm292_vm3, %v291_v7  ;;  %v419_v12 = vpop.f32.mrb[3].mxu0 }
  0xe8   : > { %v275_v13 = vadd.f32 %v274_v9, %v273_v5  ;;  %v284_v14 = vrot.slane %v283_v11, 4 }
  0xea   : > { %v276_v15 = vrot.slane %v275_v13, 2  ;;  %v285_v16 = vadd.f32 %v284_v14, %v283_v11 }
  0xec   : > { %v277_v17 = vadd.f32 %v276_v15, %v275_v13  ;;  %v286_v18 = vrot.slane %v285_v16, 2 }
  0xee   : > { %v278_v19 = vrot.slane %v277_v17, 1  ;;  %v287_v20 = vadd.f32 %v286_v18, %v285_v16 }
  0xf0   : > { %v279_v21 = vadd.f32 %v278_v19, %v277_v17  ;;  %v288_v22 = vrot.slane %v287_v20, 1 }
  0xf2   : > { %281 = vst.msk [vmem:[%s206_s30] sm:$0x1] %vm280_vm4, %v279_v21  ;;  %v289_v23 = vadd.f32 %v288_v22, %v287_v20 }
  0xf4   : > { %290 = vst.msk [vmem:[%s209_s7] sm:$0x1] %vm280_vm4, %v289_v23 }
  0xf5 PF: > { %s15_s15 = sadd.s32 1, %s438_s15  }
  0xf6   : > { %p12_p4 = scmp.ge.s32.totalorder %s15_s15, 4  }
  0xf8   :  { %14 = sbr.rel (!%p12_p4) target bundleno = 1 (0x1), region = 82 }

</bundles_post_ra>
